<compile_context>
chip_gen: v7x
topology: tpu7x:2x2x1
jax: 0.10.0
libtpu: 0.0.40
codegen_flags: <defaults>
</compile_context>

<pallas_src>
import functools

import jax
import jax.numpy as jnp
from jax import lax
from jax.experimental import pallas as pl
from jax.experimental.pallas import tpu as pltpu

EPS = 1e-5
LANE = 128


def _round_up(n, m):
    return (n + m - 1) // m * m


def _vmem_limit_bytes():
    """Generation-aware scoped-VMEM limit (~48 MiB on v7x, ~96 MiB on v5e/v6e)."""
    try:
        phys = int(pltpu.get_tpu_info().vmem_capacity_bytes)
    except Exception:
        phys = 128 * 1024 * 1024
    return int(max(16 * 2**20, min(0.75 * phys, 100 * 2**20)))


def _choose_tb(B, L, C, P, vmem_limit):
    """Samples per grid block: maximize the MXU M-dim (TB*L rows), keep >= 4 grid
    steps when the batch is large enough, respect the (8,128) layout rule and the
    VMEM budget.  TB always divides B so every block holds whole samples (keeps
    the per-block BN partial statistics exact)."""
    target_m = 512
    min_tb_for_mxu = max(1, -(-256 // max(L, 1)))   # ceil(256 / L)
    cap = max(1, target_m // max(L, 1))
    if B >= 4 * min_tb_for_mxu:                     # batch large enough: keep grid deep too
        cap = min(cap, max(1, B // 4))
    best = None
    for tb in range(1, B + 1):
        if B % tb or tb > cap:
            continue
        m = tb * L
        if (m % 8) and tb != B:                     # (8,128) block-shape rule
            continue
        need = 2 * 4 * m * (C + 2 * P) + 8 * 3 * C * P   # rough double-buffer estimate
        if need > vmem_limit // 2:
            continue
        best = tb
    return B if best is None else best


# ---------------------------------------------------------------------------
# kernels
# ---------------------------------------------------------------------------
def _conv_stage_kernel(relu, mat_dtype, x_ref, s_ref, t_ref, w_ref,
                       mp_ref, mn_ref, y_ref, stat_ref):
    """Folded BN (scale/shift) [-> ReLU] -> k=3 'same' conv on one (TB*L, C) tile.

    The conv is three accumulating MXU matmuls against the pre-split weight
    slices w[k] (no (M, 3C) concat temporary).  Sample boundaries coincide with
    tile-row boundaries, so the conv's zero padding is a precomputed 0/1
    boundary-row mask multiply (no full-tile iota/select).  Per-tile sum and
    sum-of-squares of the conv output are emitted so the wrapper can fold the
    *next* BN's training-mode batch statistics without re-reading activations.
    """
    h = x_ref[...] * s_ref[...] + t_ref[...]                  # (M, C) f32, folded BN
    if relu:
        h = jnp.maximum(h, 0.0)
    m = h.shape[0]
    prev = pltpu.roll(h, shift=1, axis=0) * mp_ref[...]       # h[l-1], zero at l == 0
    nxt = pltpu.roll(h, shift=m - 1, axis=0) * mn_ref[...]    # h[l+1], zero at l == L-1
    acc = jnp.dot(prev.astype(mat_dtype), w_ref[0], preferred_element_type=jnp.float32)
    acc = acc + jnp.dot(h.astype(mat_dtype), w_ref[1], preferred_element_type=jnp.float32)
    acc = acc + jnp.dot(nxt.astype(mat_dtype), w_ref[2], preferred_element_type=jnp.float32)
    y_ref[...] = acc
    p = acc.shape[1]
    stat_ref[...] = jnp.concatenate(                          # 8 sublanes -> unmasked store
        [jnp.sum(acc, axis=0, keepdims=True),
         jnp.sum(acc * acc, axis=0, keepdims=True),
         jnp.zeros((6, p), jnp.float32)], axis=0)


def _bn_residual_kernel(y_ref, s_ref, t_ref, x_ref, o_ref):
    """BN3 (folded scale/shift) + residual add (x is already lane-zero-padded)."""
    o_ref[...] = y_ref[...] * s_ref[...] + t_ref[...] + x_ref[...]


# ---------------------------------------------------------------------------
# pallas_call wrappers
# ---------------------------------------------------------------------------
def _conv_stage(x2d, s, t, w, mprev, mnext, relu, tbl, vmem_limit):
    n, c = x2d.shape
    p = w.shape[-1]
    nblk = n // tbl
    flops = 2 * n * 3 * c * p
    bytes_acc = (4 * (n * c + n * p + nblk * 8 * p + 2 * c + 2 * tbl)
                 + 3 * c * p * w.dtype.itemsize)
    y, st = pl.pallas_call(
        functools.partial(_conv_stage_kernel, relu, w.dtype),
        grid=(nblk,),
        in_specs=[
            pl.BlockSpec((tbl, c), lambda i: (i, 0)),
            pl.BlockSpec((1, c), lambda i: (0, 0)),
            pl.BlockSpec((1, c), lambda i: (0, 0)),
            # constant-index blocks below are fetched once and stay resident.
            # TODO(synk): pipeline_mode=pl.Buffered(1) would drop their second
            # VMEM buffer; left at the default for maximum compile portability.
            pl.BlockSpec((3, c, p), lambda i: (0, 0, 0)),
            pl.BlockSpec((tbl, 1), lambda i: (0, 0)),
            pl.BlockSpec((tbl, 1), lambda i: (0, 0)),
        ],
        out_specs=[
            pl.BlockSpec((tbl, p), lambda i: (i, 0)),
            pl.BlockSpec((None, 8, p), lambda i: (i, 0, 0)),
        ],
        out_shape=[jax.ShapeDtypeStruct((n, p), jnp.float32),
                   jax.ShapeDtypeStruct((nblk, 8, p), jnp.float32)],
        compiler_params=pltpu.CompilerParams(
            dimension_semantics=("parallel",),
            vmem_limit_bytes=vmem_limit),
        cost_estimate=pl.CostEstimate(flops=flops, transcendentals=0,
                                      bytes_accessed=bytes_acc),
    )(x2d, s, t, w, mprev, mnext)
    return y, st


def _bn_residual_stage(y2d, s, t, x2d, tbl, vmem_limit):
    n, p = y2d.shape
    return pl.pallas_call(
        _bn_residual_kernel,
        grid=(n // tbl,),
        in_specs=[pl.BlockSpec((tbl, p), lambda i: (i, 0)),
                  pl.BlockSpec((1, p), lambda i: (0, 0)),
                  pl.BlockSpec((1, p), lambda i: (0, 0)),
                  pl.BlockSpec((tbl, p), lambda i: (i, 0))],
        out_specs=pl.BlockSpec((tbl, p), lambda i: (i, 0)),
        out_shape=jax.ShapeDtypeStruct((n, p), jnp.float32),
        compiler_params=pltpu.CompilerParams(
            dimension_semantics=("parallel",),
            vmem_limit_bytes=vmem_limit),
        cost_estimate=pl.CostEstimate(flops=3 * n * p, transcendentals=0,
                                      bytes_accessed=4 * (3 * n * p + 2 * p)),
    )(y2d, s, t, x2d)


# ---------------------------------------------------------------------------
# host-side helpers
# ---------------------------------------------------------------------------
def _bn_affine(ssum, ssq, count, gamma, beta, cp):
    """Fold training-mode BN (biased batch stats) into a lane-padded per-channel
    scale/shift of width cp.  Padded lanes get scale = shift = 0, so padded
    activation channels stay exactly zero (they double as the shortcut pad)."""
    c = gamma.shape[0]
    mean = ssum[:c] / count
    # TODO(synk): single-pass E[x^2]-E[x]^2 can cancel badly at very large B*L;
    # switch to a two-pass / Welford reduction if tolerances tighten at scale.
    var = jnp.maximum(ssq[:c] / count - mean * mean, 0.0)
    scale = gamma.astype(jnp.float32) * lax.rsqrt(var + EPS)
    shift = beta.astype(jnp.float32) - mean * scale
    pad = cp - c
    return jnp.pad(scale, (0, pad))[None, :], jnp.pad(shift, (0, pad))[None, :]


def _pack_conv(w, cp, dtype):
    """torch Conv1d weight (O, I, 3) -> (3, cp, cp) matmul slices, zero padded.
    Slice k multiplies h[l + k - 1]; layout is [in_ch, out_ch]."""
    o, i, _ = w.shape
    wp = jnp.zeros((3, cp, cp), jnp.float32)
    wp = wp.at[:, :i, :o].set(jnp.transpose(jnp.asarray(w, jnp.float32), (2, 1, 0)))
    return wp.astype(dtype)


def basic_block_forward(x_ncl, params, planes, stride=1, use_bf16=False):
    # TODO(synk): stride > 1 / downsample path not implemented (the reference
    # module with downsample=None and stride > 1 would break its own residual
    # add as well).
    assert stride == 1
    B, Cin, L = x_ncl.shape
    if Cin > planes:
        raise ValueError("residual channels must be >= shortcut channels")
    # One padded lane width shared by every stage.
    # TODO(synk): on v6e/v7x, padding to a multiple of 256 when planes > 128
    # would double MXU column utilization; kept at 128 for v5e friendliness.
    Cp = _round_up(max(planes, Cin, LANE), LANE)
    n = B * L

    x = jnp.asarray(x_ncl, jnp.float32)
    # BN1 training-mode batch stats in one fused pass over the *unpadded* input
    # (avoids extra HBM passes over the much larger lane-padded copy).
    s1, t1 = _bn_affine(x.sum(axis=(0, 2)), (x * x).sum(axis=(0, 2)), n,
                        params["g1"], params["b1"], Cp)

    # channels-last + lane zero-padding, flattened to (B*L, Cp); this padded
    # copy is also the zero-channel-padded shortcut.
    # TODO(synk): keeping the surrounding model channels-last would remove this
    # transpose/pad and the final transpose back to NCL.
    x2d = jnp.pad(jnp.transpose(x, (0, 2, 1)),
                  ((0, 0), (0, 0), (0, Cp - Cin))).reshape(n, Cp)

    mat_dtype = jnp.bfloat16 if use_bf16 else jnp.float32
    w1 = _pack_conv(params["conv1"], Cp, mat_dtype)
    w2 = _pack_conv(params["conv2"], Cp, mat_dtype)

    vmem_limit = _vmem_limit_bytes()
    TB = _choose_tb(B, L, Cp, Cp, vmem_limit)
    tbl = TB * L
    l_idx = jnp.arange(tbl) % L
    mprev = (l_idx != 0).astype(jnp.float32).reshape(tbl, 1)
    mnext = (l_idx != (L - 1)).astype(jnp.float32).reshape(tbl, 1)

    # stage 1: BN1 -> conv1   (+ per-block partial stats for BN2)
    y1, st1 = _conv_stage(x2d, s1, t1, w1, mprev, mnext, relu=False,
                          tbl=tbl, vmem_limit=vmem_limit)
    s2, t2 = _bn_affine(st1[:, 0, :].sum(0), st1[:, 1, :].sum(0), n,
                        params["g2"], params["b2"], Cp)

    # stage 2: BN2 -> ReLU -> conv2   (+ per-block partial stats for BN3)
    y2, st2 = _conv_stage(y1, s2, t2, w2, mprev, mnext, relu=True,
                          tbl=tbl, vmem_limit=vmem_limit)
    s3, t3 = _bn_affine(st2[:, 0, :].sum(0), st2[:, 1, :].sum(0), n,
                        params["g3"], params["b3"], Cp)

    # stage 3: BN3 + zero-channel-padded residual add (x2d *is* the shortcut)
    out2d = _bn_residual_stage(y2, s3, t3, x2d, tbl, vmem_limit)

    out = out2d.reshape(B, L, Cp)[:, :, :planes]
    return jnp.transpose(out, (0, 2, 1))        # back to NCL


# ---------------------------------------------------------------------------
# pure-JAX reference (training-mode BN) and test harness
# ---------------------------------------------------------------------------
def reference_forward(x, p, planes):
    def bn(t, g, b):
        m = t.mean(axis=(0, 2), keepdims=True)
        v = ((t - m) ** 2).mean(axis=(0, 2), keepdims=True)
        return (t - m) / jnp.sqrt(v + EPS) * g[None, :, None] + b[None, :, None]

    dn = ("NCH", "OIH", "NCH")
    h = bn(x, p["g1"], p["b1"])
    h = lax.conv_general_dilated(h, p["conv1"], (1,), [(1, 1)], dimension_numbers=dn)
    h = jax.nn.relu(bn(h, p["g2"], p["b2"]))
    h = lax.conv_general_dilated(h, p["conv2"], (1,), [(1, 1)], dimension_numbers=dn)
    h = bn(h, p["g3"], p["b3"])
    Cout, Cin = h.shape[1], x.shape[1]
    sc = x if Cout == Cin else jnp.pad(x, ((0, 0), (0, Cout - Cin), (0, 0)))
    return h + sc


def init_params(key, inplanes, planes):
    ks = jax.random.split(key, 5)

    def bn_pair(k, c):
        k1, k2 = jax.random.split(k)
        return (jax.random.uniform(k1, (c,), jnp.float32, 0.5, 1.5),
                0.1 * jax.random.normal(k2, (c,), jnp.float32))

    g1, b1 = bn_pair(ks[0], inplanes)
    g2, b2 = bn_pair(ks[1], planes)
    g3, b3 = bn_pair(ks[2], planes)
    conv1 = jax.random.normal(ks[3], (planes, inplanes, 3), jnp.float32) / jnp.sqrt(3 * inplanes)
    conv2 = jax.random.normal(ks[4], (planes, planes, 3), jnp.float32) / jnp.sqrt(3 * planes)
    return dict(g1=g1, b1=b1, g2=g2, b2=b2, g3=g3, b3=b3, conv1=conv1, conv2=conv2)


if __name__ == "__main__":
    B, inplanes, planes, L = 2, 8, 16, 16   # planes > inplanes -> padded shortcut path
    key = jax.random.PRNGKey(0)
    kx, kp = jax.random.split(key)
    x = jax.random.normal(kx, (B, inplanes, L), jnp.float32)   # NCL, like Conv1d input
    params = init_params(kp, inplanes, planes)

    ref = jax.block_until_ready(reference_forward(x, params, planes))
    fwd = jax.jit(basic_block_forward, static_argnames=("planes", "stride", "use_bf16"))

    # f32 matmul path: strict tolerance.
    out = jax.block_until_ready(fwd(x, params, planes=planes))
    assert out.shape == (B, planes, L)
    err = float(jnp.max(jnp.abs(out - ref)))
    assert jnp.allclose(out, ref, rtol=1e-3, atol=1e-3), f"f32 path err={err}"

    # bf16 MXU-operand path (f32 accumulation): looser tolerance.
    out_bf = jax.block_until_ready(fwd(x, params, planes=planes, use_bf16=True))
    err_bf = float(jnp.max(jnp.abs(out_bf - ref)))
    assert jnp.allclose(out_bf, ref, rtol=5e-2, atol=5e-2), f"bf16 path err={err_bf}"

    print("KERNEL_OK")
</pallas_src>

<mosaic_0001>
module attributes {stable_mosaic.version = 11 : i64} {
  func.func @_bn_residual_kernel(%arg0: i32, %arg1: memref<32x128xf32, #tpu.memory_space<vmem>>, %arg2: memref<1x128xf32, #tpu.memory_space<vmem>>, %arg3: memref<1x128xf32, #tpu.memory_space<vmem>>, %arg4: memref<32x128xf32, #tpu.memory_space<vmem>>, %arg5: memref<32x128xf32, #tpu.memory_space<vmem>>) attributes {dimension_semantics = [#tpu.dimension_semantics<parallel>], iteration_bounds = array<i64: 1>, scalar_prefetch = 0 : i64, scratch_operands = 0 : i64, tpu.core_type = #tpu.core_type<tc>, window_params = [{transform_indices = @transform_0, window_bounds = array<i64: 32, 128>}, {pipeline_mode = #tpu.pipeline_mode<synchronous>, transform_indices = @transform_1, window_bounds = array<i64: 1, 128>}, {pipeline_mode = #tpu.pipeline_mode<synchronous>, transform_indices = @transform_2, window_bounds = array<i64: 1, 128>}, {transform_indices = @transform_3, window_bounds = array<i64: 32, 128>}, {transform_indices = @transform_4, window_bounds = array<i64: 32, 128>}]} {
    %c0 = arith.constant 0 : index
    %c0_0 = arith.constant 0 : index
    %0 = vector.load %arg1[%c0, %c0_0] : memref<32x128xf32, #tpu.memory_space<vmem>>, vector<32x128xf32>
    %c0_1 = arith.constant 0 : index
    %c0_2 = arith.constant 0 : index
    %1 = vector.load %arg2[%c0_1, %c0_2] : memref<1x128xf32, #tpu.memory_space<vmem>>, vector<1x128xf32>
    %2 = vector.broadcast %1 : vector<1x128xf32> to vector<32x128xf32>
    %3 = arith.mulf %0, %2 : vector<32x128xf32>
    %c0_3 = arith.constant 0 : index
    %c0_4 = arith.constant 0 : index
    %4 = vector.load %arg3[%c0_3, %c0_4] : memref<1x128xf32, #tpu.memory_space<vmem>>, vector<1x128xf32>
    %5 = vector.broadcast %4 : vector<1x128xf32> to vector<32x128xf32>
    %6 = arith.addf %3, %5 : vector<32x128xf32>
    %c0_5 = arith.constant 0 : index
    %c0_6 = arith.constant 0 : index
    %7 = vector.load %arg4[%c0_5, %c0_6] : memref<32x128xf32, #tpu.memory_space<vmem>>, vector<32x128xf32>
    %8 = arith.addf %6, %7 : vector<32x128xf32>
    %c0_7 = arith.constant 0 : index
    %c0_8 = arith.constant 0 : index
    %9 = vector.load %arg5[%c0_7, %c0_8] : memref<32x128xf32, #tpu.memory_space<vmem>>, vector<32x128xf32>
    tpu.vector_store %arg5[%c0_7, %c0_8], %8 {strides = array<i32>} : memref<32x128xf32, #tpu.memory_space<vmem>>, vector<32x128xf32>,
    return
  }
  func.func @transform_0(%arg0: i32) -> (i32, i32) {
    %c0_i32 = arith.constant 0 : i32
    %c0_i32_0 = arith.constant 0 : i32
    return %arg0, %c0_i32 : i32, i32
  }
  func.func @transform_1(%arg0: i32) -> (i32, i32) {
    %c0_i32 = arith.constant 0 : i32
    %c0_i32_0 = arith.constant 0 : i32
    %c0_i32_1 = arith.constant 0 : i32
    return %c0_i32, %c0_i32_0 : i32, i32
  }
  func.func @transform_2(%arg0: i32) -> (i32, i32) {
    %c0_i32 = arith.constant 0 : i32
    %c0_i32_0 = arith.constant 0 : i32
    %c0_i32_1 = arith.constant 0 : i32
    return %c0_i32, %c0_i32_0 : i32, i32
  }
  func.func @transform_3(%arg0: i32) -> (i32, i32) {
    %c0_i32 = arith.constant 0 : i32
    %c0_i32_0 = arith.constant 0 : i32
    return %arg0, %c0_i32 : i32, i32
  }
  func.func @transform_4(%arg0: i32) -> (i32, i32) {
    %c0_i32 = arith.constant 0 : i32
    %c0_i32_0 = arith.constant 0 : i32
    return %arg0, %c0_i32 : i32, i32
  }
}

module attributes {stable_mosaic.version = 11 : i64} {
  func.func @_conv_stage_kernel(%arg0: i32, %arg1: memref<32x128xf32, #tpu.memory_space<vmem>>, %arg2: memref<1x128xf32, #tpu.memory_space<vmem>>, %arg3: memref<1x128xf32, #tpu.memory_space<vmem>>, %arg4: memref<3x128x128xf32, #tpu.memory_space<vmem>>, %arg5: memref<32x1xf32, #tpu.memory_space<vmem>>, %arg6: memref<32x1xf32, #tpu.memory_space<vmem>>, %arg7: memref<32x128xf32, #tpu.memory_space<vmem>>, %arg8: memref<1x8x128xf32, #tpu.memory_space<vmem>>) attributes {dimension_semantics = [#tpu.dimension_semantics<parallel>], iteration_bounds = array<i64: 1>, scalar_prefetch = 0 : i64, scratch_operands = 0 : i64, tpu.core_type = #tpu.core_type<tc>, window_params = [{transform_indices = @transform_0, window_bounds = array<i64: 32, 128>}, {pipeline_mode = #tpu.pipeline_mode<synchronous>, transform_indices = @transform_1, window_bounds = array<i64: 1, 128>}, {pipeline_mode = #tpu.pipeline_mode<synchronous>, transform_indices = @transform_2, window_bounds = array<i64: 1, 128>}, {pipeline_mode = #tpu.pipeline_mode<synchronous>, transform_indices = @transform_3, window_bounds = array<i64: 3, 128, 128>}, {pipeline_mode = #tpu.pipeline_mode<synchronous>, transform_indices = @transform_4, window_bounds = array<i64: 32, 1>}, {pipeline_mode = #tpu.pipeline_mode<synchronous>, transform_indices = @transform_5, window_bounds = array<i64: 32, 1>}, {transform_indices = @transform_6, window_bounds = array<i64: 32, 128>}, {transform_indices = @transform_7, window_bounds = array<i64: 1, 8, 128>}]} {
    %c0 = arith.constant 0 : index
    %c0_0 = arith.constant 0 : index
    %0 = vector.load %arg1[%c0, %c0_0] : memref<32x128xf32, #tpu.memory_space<vmem>>, vector<32x128xf32>
    %c0_1 = arith.constant 0 : index
    %c0_2 = arith.constant 0 : index
    %1 = vector.load %arg2[%c0_1, %c0_2] : memref<1x128xf32, #tpu.memory_space<vmem>>, vector<1x128xf32>
    %2 = vector.broadcast %1 : vector<1x128xf32> to vector<32x128xf32>
    %3 = arith.mulf %0, %2 : vector<32x128xf32>
    %c0_3 = arith.constant 0 : index
    %c0_4 = arith.constant 0 : index
    %4 = vector.load %arg3[%c0_3, %c0_4] : memref<1x128xf32, #tpu.memory_space<vmem>>, vector<1x128xf32>
    %5 = vector.broadcast %4 : vector<1x128xf32> to vector<32x128xf32>
    %6 = arith.addf %3, %5 : vector<32x128xf32>
    %c1_i32 = arith.constant 1 : i32
    %7 = tpu.dynamic_rotate %6 by %c1_i32 dim 0 : vector<32x128xf32>, i32 -> vector<32x128xf32>
    %c0_5 = arith.constant 0 : index
    %c0_6 = arith.constant 0 : index
    %8 = vector.load %arg5[%c0_5, %c0_6] : memref<32x1xf32, #tpu.memory_space<vmem>>, vector<32x1xf32>
    %9 = vector.broadcast %8 : vector<32x1xf32> to vector<32x128xf32>
    %10 = arith.mulf %7, %9 : vector<32x128xf32>
    %c31_i32 = arith.constant 31 : i32
    %11 = tpu.dynamic_rotate %6 by %c31_i32 dim 0 : vector<32x128xf32>, i32 -> vector<32x128xf32>
    %c0_7 = arith.constant 0 : index
    %c0_8 = arith.constant 0 : index
    %12 = vector.load %arg6[%c0_7, %c0_8] : memref<32x1xf32, #tpu.memory_space<vmem>>, vector<32x1xf32>
    %13 = vector.broadcast %12 : vector<32x1xf32> to vector<32x128xf32>
    %14 = arith.mulf %11, %13 : vector<32x128xf32>
    %c0_9 = arith.constant 0 : index
    %c0_10 = arith.constant 0 : index
    %c0_11 = arith.constant 0 : index
    %15 = vector.load %arg4[%c0_9, %c0_10, %c0_11] : memref<3x128x128xf32, #tpu.memory_space<vmem>>, vector<1x128x128xf32>
    %16 = vector.shape_cast %15 : vector<1x128x128xf32> to vector<128x128xf32>
    %cst = arith.constant dense<0.000000e+00> : vector<32x128xf32>
    %17 = tpu.matmul %10, %16, %cst {dimension_numbers = #tpu.dot_dimension_numbers<[1], [0], [0], [1], [0, 0, 1, 1], [], []>} : vector<32x128xf32>, vector<128x128xf32>, vector<32x128xf32> -> vector<32x128xf32>
    %c1 = arith.constant 1 : index
    %c0_12 = arith.constant 0 : index
    %c0_13 = arith.constant 0 : index
    %18 = vector.load %arg4[%c1, %c0_12, %c0_13] : memref<3x128x128xf32, #tpu.memory_space<vmem>>, vector<1x128x128xf32>
    %19 = vector.shape_cast %18 : vector<1x128x128xf32> to vector<128x128xf32>
    %cst_14 = arith.constant dense<0.000000e+00> : vector<32x128xf32>
    %20 = tpu.matmul %6, %19, %cst_14 {dimension_numbers = #tpu.dot_dimension_numbers<[1], [0], [0], [1], [0, 0, 1, 1], [], []>} : vector<32x128xf32>, vector<128x128xf32>, vector<32x128xf32> -> vector<32x128xf32>
    %21 = arith.addf %17, %20 : vector<32x128xf32>
    %c2 = arith.constant 2 : index
    %c0_15 = arith.constant 0 : index
    %c0_16 = arith.constant 0 : index
    %22 = vector.load %arg4[%c2, %c0_15, %c0_16] : memref<3x128x128xf32, #tpu.memory_space<vmem>>, vector<1x128x128xf32>
    %23 = vector.shape_cast %22 : vector<1x128x128xf32> to vector<128x128xf32>
    %cst_17 = arith.constant dense<0.000000e+00> : vector<32x128xf32>
    %24 = tpu.matmul %14, %23, %cst_17 {dimension_numbers = #tpu.dot_dimension_numbers<[1], [0], [0], [1], [0, 0, 1, 1], [], []>} : vector<32x128xf32>, vector<128x128xf32>, vector<32x128xf32> -> vector<32x128xf32>
    %25 = arith.addf %21, %24 : vector<32x128xf32>
    %c0_18 = arith.constant 0 : index
    %c0_19 = arith.constant 0 : index
    %26 = vector.load %arg7[%c0_18, %c0_19] : memref<32x128xf32, #tpu.memory_space<vmem>>, vector<32x128xf32>
    tpu.vector_store %arg7[%c0_18, %c0_19], %25 {strides = array<i32>} : memref<32x128xf32, #tpu.memory_space<vmem>>, vector<32x128xf32>,
    %cst_20 = arith.constant dense<0.000000e+00> : vector<128xf32>
    %27 = vector.multi_reduction <add>, %25, %cst_20 [0] : vector<32x128xf32> to vector<128xf32>
    %28 = vector.shape_cast %27 : vector<128xf32> to vector<1x128xf32>
    %29 = arith.mulf %25, %25 : vector<32x128xf32>
    %cst_21 = arith.constant dense<0.000000e+00> : vector<128xf32>
    %30 = vector.multi_reduction <add>, %29, %cst_21 [0] : vector<32x128xf32> to vector<128xf32>
    %31 = vector.shape_cast %30 : vector<128xf32> to vector<1x128xf32>
    %cst_22 = arith.constant 0.000000e+00 : f32
    %32 = vector.broadcast %cst_22 : f32 to vector<6x128xf32>
    %33 = tpu.concatenate %28, %31, %32 in 0 : vector<1x128xf32>, vector<1x128xf32>, vector<6x128xf32> -> vector<8x128xf32>
    %c0_23 = arith.constant 0 : index
    %c0_24 = arith.constant 0 : index
    %c0_25 = arith.constant 0 : index
    %34 = vector.load %arg8[%c0_23, %c0_24, %c0_25] : memref<1x8x128xf32, #tpu.memory_space<vmem>>, vector<1x8x128xf32>
    %35 = vector.shape_cast %34 : vector<1x8x128xf32> to vector<8x128xf32>
    %36 = vector.shape_cast %33 : vector<8x128xf32> to vector<1x8x128xf32>
    tpu.vector_store %arg8[%c0_23, %c0_24, %c0_25], %36 {strides = array<i32>} : memref<1x8x128xf32, #tpu.memory_space<vmem>>, vector<1x8x128xf32>,
    return
  }
  func.func @transform_0(%arg0: i32) -> (i32, i32) {
    %c0_i32 = arith.constant 0 : i32
    %c0_i32_0 = arith.constant 0 : i32
    return %arg0, %c0_i32 : i32, i32
  }
  func.func @transform_1(%arg0: i32) -> (i32, i32) {
    %c0_i32 = arith.constant 0 : i32
    %c0_i32_0 = arith.constant 0 : i32
    %c0_i32_1 = arith.constant 0 : i32
    return %c0_i32, %c0_i32_0 : i32, i32
  }
  func.func @transform_2(%arg0: i32) -> (i32, i32) {
    %c0_i32 = arith.constant 0 : i32
    %c0_i32_0 = arith.constant 0 : i32
    %c0_i32_1 = arith.constant 0 : i32
    return %c0_i32, %c0_i32_0 : i32, i32
  }
  func.func @transform_3(%arg0: i32) -> (i32, i32, i32) {
    %c0_i32 = arith.constant 0 : i32
    %c0_i32_0 = arith.constant 0 : i32
    %c0_i32_1 = arith.constant 0 : i32
    %c0_i32_2 = arith.constant 0 : i32
    return %c0_i32, %c0_i32_0, %c0_i32_1 : i32, i32, i32
  }
  func.func @transform_4(%arg0: i32) -> (i32, i32) {
    %c0_i32 = arith.constant 0 : i32
    %c0_i32_0 = arith.constant 0 : i32
    %c0_i32_1 = arith.constant 0 : i32
    return %c0_i32, %c0_i32_0 : i32, i32
  }
  func.func @transform_5(%arg0: i32) -> (i32, i32) {
    %c0_i32 = arith.constant 0 : i32
    %c0_i32_0 = arith.constant 0 : i32
    %c0_i32_1 = arith.constant 0 : i32
    return %c0_i32, %c0_i32_0 : i32, i32
  }
  func.func @transform_6(%arg0: i32) -> (i32, i32) {
    %c0_i32 = arith.constant 0 : i32
    %c0_i32_0 = arith.constant 0 : i32
    return %arg0, %c0_i32 : i32, i32
  }
  func.func @transform_7(%arg0: i32) -> (i32, i32, i32) {
    %c0_i32 = arith.constant 0 : i32
    %c0_i32_0 = arith.constant 0 : i32
    %c0_i32_1 = arith.constant 0 : i32
    return %arg0, %c0_i32, %c0_i32_0 : i32, i32, i32
  }
}

module attributes {stable_mosaic.version = 11 : i64} {
  func.func @_conv_stage_kernel(%arg0: i32, %arg1: memref<32x128xf32, #tpu.memory_space<vmem>>, %arg2: memref<1x128xf32, #tpu.memory_space<vmem>>, %arg3: memref<1x128xf32, #tpu.memory_space<vmem>>, %arg4: memref<3x128x128xf32, #tpu.memory_space<vmem>>, %arg5: memref<32x1xf32, #tpu.memory_space<vmem>>, %arg6: memref<32x1xf32, #tpu.memory_space<vmem>>, %arg7: memref<32x128xf32, #tpu.memory_space<vmem>>, %arg8: memref<1x8x128xf32, #tpu.memory_space<vmem>>) attributes {dimension_semantics = [#tpu.dimension_semantics<parallel>], iteration_bounds = array<i64: 1>, scalar_prefetch = 0 : i64, scratch_operands = 0 : i64, tpu.core_type = #tpu.core_type<tc>, window_params = [{transform_indices = @transform_0, window_bounds = array<i64: 32, 128>}, {pipeline_mode = #tpu.pipeline_mode<synchronous>, transform_indices = @transform_1, window_bounds = array<i64: 1, 128>}, {pipeline_mode = #tpu.pipeline_mode<synchronous>, transform_indices = @transform_2, window_bounds = array<i64: 1, 128>}, {pipeline_mode = #tpu.pipeline_mode<synchronous>, transform_indices = @transform_3, window_bounds = array<i64: 3, 128, 128>}, {pipeline_mode = #tpu.pipeline_mode<synchronous>, transform_indices = @transform_4, window_bounds = array<i64: 32, 1>}, {pipeline_mode = #tpu.pipeline_mode<synchronous>, transform_indices = @transform_5, window_bounds = array<i64: 32, 1>}, {transform_indices = @transform_6, window_bounds = array<i64: 32, 128>}, {transform_indices = @transform_7, window_bounds = array<i64: 1, 8, 128>}]} {
    %c0 = arith.constant 0 : index
    %c0_0 = arith.constant 0 : index
    %0 = vector.load %arg1[%c0, %c0_0] : memref<32x128xf32, #tpu.memory_space<vmem>>, vector<32x128xf32>
    %c0_1 = arith.constant 0 : index
    %c0_2 = arith.constant 0 : index
    %1 = vector.load %arg2[%c0_1, %c0_2] : memref<1x128xf32, #tpu.memory_space<vmem>>, vector<1x128xf32>
    %2 = vector.broadcast %1 : vector<1x128xf32> to vector<32x128xf32>
    %3 = arith.mulf %0, %2 : vector<32x128xf32>
    %c0_3 = arith.constant 0 : index
    %c0_4 = arith.constant 0 : index
    %4 = vector.load %arg3[%c0_3, %c0_4] : memref<1x128xf32, #tpu.memory_space<vmem>>, vector<1x128xf32>
    %5 = vector.broadcast %4 : vector<1x128xf32> to vector<32x128xf32>
    %6 = arith.addf %3, %5 : vector<32x128xf32>
    %cst = arith.constant 0.000000e+00 : f32
    %7 = vector.broadcast %cst : f32 to vector<32x128xf32>
    %8 = arith.maximumf %6, %7 : vector<32x128xf32>
    %c1_i32 = arith.constant 1 : i32
    %9 = tpu.dynamic_rotate %8 by %c1_i32 dim 0 : vector<32x128xf32>, i32 -> vector<32x128xf32>
    %c0_5 = arith.constant 0 : index
    %c0_6 = arith.constant 0 : index
    %10 = vector.load %arg5[%c0_5, %c0_6] : memref<32x1xf32, #tpu.memory_space<vmem>>, vector<32x1xf32>
    %11 = vector.broadcast %10 : vector<32x1xf32> to vector<32x128xf32>
    %12 = arith.mulf %9, %11 : vector<32x128xf32>
    %c31_i32 = arith.constant 31 : i32
    %13 = tpu.dynamic_rotate %8 by %c31_i32 dim 0 : vector<32x128xf32>, i32 -> vector<32x128xf32>
    %c0_7 = arith.constant 0 : index
    %c0_8 = arith.constant 0 : index
    %14 = vector.load %arg6[%c0_7, %c0_8] : memref<32x1xf32, #tpu.memory_space<vmem>>, vector<32x1xf32>
    %15 = vector.broadcast %14 : vector<32x1xf32> to vector<32x128xf32>
    %16 = arith.mulf %13, %15 : vector<32x128xf32>
    %c0_9 = arith.constant 0 : index
    %c0_10 = arith.constant 0 : index
    %c0_11 = arith.constant 0 : index
    %17 = vector.load %arg4[%c0_9, %c0_10, %c0_11] : memref<3x128x128xf32, #tpu.memory_space<vmem>>, vector<1x128x128xf32>
    %18 = vector.shape_cast %17 : vector<1x128x128xf32> to vector<128x128xf32>
    %cst_12 = arith.constant dense<0.000000e+00> : vector<32x128xf32>
    %19 = tpu.matmul %12, %18, %cst_12 {dimension_numbers = #tpu.dot_dimension_numbers<[1], [0], [0], [1], [0, 0, 1, 1], [], []>} : vector<32x128xf32>, vector<128x128xf32>, vector<32x128xf32> -> vector<32x128xf32>
    %c1 = arith.constant 1 : index
    %c0_13 = arith.constant 0 : index
    %c0_14 = arith.constant 0 : index
    %20 = vector.load %arg4[%c1, %c0_13, %c0_14] : memref<3x128x128xf32, #tpu.memory_space<vmem>>, vector<1x128x128xf32>
    %21 = vector.shape_cast %20 : vector<1x128x128xf32> to vector<128x128xf32>
    %cst_15 = arith.constant dense<0.000000e+00> : vector<32x128xf32>
    %22 = tpu.matmul %8, %21, %cst_15 {dimension_numbers = #tpu.dot_dimension_numbers<[1], [0], [0], [1], [0, 0, 1, 1], [], []>} : vector<32x128xf32>, vector<128x128xf32>, vector<32x128xf32> -> vector<32x128xf32>
    %23 = arith.addf %19, %22 : vector<32x128xf32>
    %c2 = arith.constant 2 : index
    %c0_16 = arith.constant 0 : index
    %c0_17 = arith.constant 0 : index
    %24 = vector.load %arg4[%c2, %c0_16, %c0_17] : memref<3x128x128xf32, #tpu.memory_space<vmem>>, vector<1x128x128xf32>
    %25 = vector.shape_cast %24 : vector<1x128x128xf32> to vector<128x128xf32>
    %cst_18 = arith.constant dense<0.000000e+00> : vector<32x128xf32>
    %26 = tpu.matmul %16, %25, %cst_18 {dimension_numbers = #tpu.dot_dimension_numbers<[1], [0], [0], [1], [0, 0, 1, 1], [], []>} : vector<32x128xf32>, vector<128x128xf32>, vector<32x128xf32> -> vector<32x128xf32>
    %27 = arith.addf %23, %26 : vector<32x128xf32>
    %c0_19 = arith.constant 0 : index
    %c0_20 = arith.constant 0 : index
    %28 = vector.load %arg7[%c0_19, %c0_20] : memref<32x128xf32, #tpu.memory_space<vmem>>, vector<32x128xf32>
    tpu.vector_store %arg7[%c0_19, %c0_20], %27 {strides = array<i32>} : memref<32x128xf32, #tpu.memory_space<vmem>>, vector<32x128xf32>,
    %cst_21 = arith.constant dense<0.000000e+00> : vector<128xf32>
    %29 = vector.multi_reduction <add>, %27, %cst_21 [0] : vector<32x128xf32> to vector<128xf32>
    %30 = vector.shape_cast %29 : vector<128xf32> to vector<1x128xf32>
    %31 = arith.mulf %27, %27 : vector<32x128xf32>
    %cst_22 = arith.constant dense<0.000000e+00> : vector<128xf32>
    %32 = vector.multi_reduction <add>, %31, %cst_22 [0] : vector<32x128xf32> to vector<128xf32>
    %33 = vector.shape_cast %32 : vector<128xf32> to vector<1x128xf32>
    %cst_23 = arith.constant 0.000000e+00 : f32
    %34 = vector.broadcast %cst_23 : f32 to vector<6x128xf32>
    %35 = tpu.concatenate %30, %33, %34 in 0 : vector<1x128xf32>, vector<1x128xf32>, vector<6x128xf32> -> vector<8x128xf32>
    %c0_24 = arith.constant 0 : index
    %c0_25 = arith.constant 0 : index
    %c0_26 = arith.constant 0 : index
    %36 = vector.load %arg8[%c0_24, %c0_25, %c0_26] : memref<1x8x128xf32, #tpu.memory_space<vmem>>, vector<1x8x128xf32>
    %37 = vector.shape_cast %36 : vector<1x8x128xf32> to vector<8x128xf32>
    %38 = vector.shape_cast %35 : vector<8x128xf32> to vector<1x8x128xf32>
    tpu.vector_store %arg8[%c0_24, %c0_25, %c0_26], %38 {strides = array<i32>} : memref<1x8x128xf32, #tpu.memory_space<vmem>>, vector<1x8x128xf32>,
    return
  }
  func.func @transform_0(%arg0: i32) -> (i32, i32) {
    %c0_i32 = arith.constant 0 : i32
    %c0_i32_0 = arith.constant 0 : i32
    return %arg0, %c0_i32 : i32, i32
  }
  func.func @transform_1(%arg0: i32) -> (i32, i32) {
    %c0_i32 = arith.constant 0 : i32
    %c0_i32_0 = arith.constant 0 : i32
    %c0_i32_1 = arith.constant 0 : i32
    return %c0_i32, %c0_i32_0 : i32, i32
  }
  func.func @transform_2(%arg0: i32) -> (i32, i32) {
    %c0_i32 = arith.constant 0 : i32
    %c0_i32_0 = arith.constant 0 : i32
    %c0_i32_1 = arith.constant 0 : i32
    return %c0_i32, %c0_i32_0 : i32, i32
  }
  func.func @transform_3(%arg0: i32) -> (i32, i32, i32) {
    %c0_i32 = arith.constant 0 : i32
    %c0_i32_0 = arith.constant 0 : i32
    %c0_i32_1 = arith.constant 0 : i32
    %c0_i32_2 = arith.constant 0 : i32
    return %c0_i32, %c0_i32_0, %c0_i32_1 : i32, i32, i32
  }
  func.func @transform_4(%arg0: i32) -> (i32, i32) {
    %c0_i32 = arith.constant 0 : i32
    %c0_i32_0 = arith.constant 0 : i32
    %c0_i32_1 = arith.constant 0 : i32
    return %c0_i32, %c0_i32_0 : i32, i32
  }
  func.func @transform_5(%arg0: i32) -> (i32, i32) {
    %c0_i32 = arith.constant 0 : i32
    %c0_i32_0 = arith.constant 0 : i32
    %c0_i32_1 = arith.constant 0 : i32
    return %c0_i32, %c0_i32_0 : i32, i32
  }
  func.func @transform_6(%arg0: i32) -> (i32, i32) {
    %c0_i32 = arith.constant 0 : i32
    %c0_i32_0 = arith.constant 0 : i32
    return %arg0, %c0_i32 : i32, i32
  }
  func.func @transform_7(%arg0: i32) -> (i32, i32, i32) {
    %c0_i32 = arith.constant 0 : i32
    %c0_i32_0 = arith.constant 0 : i32
    %c0_i32_1 = arith.constant 0 : i32
    return %arg0, %c0_i32, %c0_i32_0 : i32, i32, i32
  }
}

</mosaic_0001>

<bundles_post_ra>
// kernel: basic_block_forward.5
= control target key start
LH: loop header
LB: loop body
LE: loop exit
PB: predicated region body
PF: predicated region fallthrough
CT: control target
= control target key end

     0   :  { %9 = vsyncpa [#allocation3], 0  ;;  %s368_s0 = inlined_call_operand.hbm [shape: f32[32,128], index: 0, kind: input, shape index: {}]   ;;  %s369_s1 = inlined_call_operand.hbm [shape: f32[1,128], index: 1, kind: input, shape index: {}]   ;;  %s370_s2 = inlined_call_operand.hbm [shape: f32[1,128], index: 2, kind: input, shape index: {}]   ;;  %s371_s3 = inlined_call_operand.hbm [shape: f32[32,128], index: 3, kind: input, shape index: {}]   ;;  %s372_s4 = inlined_call_operand.hbm [shape: f32[32,128], index: 4, kind: output, shape index: {}]  }
   0x1   :  { %10 = vsyncpa [#allocation6], 0 }
   0x2   :  { %11 = vsyncpa [#allocation9], 0 }
   0x3   :  { %12 = vsyncpa [#allocation4], 0  ;;  %s253_s15 = smov [#allocation5]   ;;  %s254_s17 = smov [#allocation2]  }
   0x4   :  { %s31_s16 = sshll.u32 %s253_s15, 4  ;;  %s18_s18 = sshll.u32 %s254_s17, 4  ;;  %s32_s16 = int_to_ptr.vmem [resolvable:$true] %s31_s16  ;;  %s285_s18 = int_to_ptr.vmem [resolvable:$true] %s18_s18 }
   0x5   :  { %s135_s21 = scalar_lea.hbm %s369_s1, 16 }
   0x6   :  { %p136_p0 = scmp.ne.s32.totalorder %s369_s1, %s135_s21  ;;  %p139_p1 = scmp.lt.u32.totalorder %s135_s21, %s369_s1 }
   0x8   :  { %p141_p2 = pnand %p139_p1, %p136_p0 }
   0xa   :  { %144 = shalt.err (!%p141_p2)
}
   0xb   :  { %s145_s26 = scalar_lea.vmem %s32_s16, 16  ;;  %s149_s27 = scalar_lea.vmem %s32_s16, 32 }
   0xc   :  { %p146_p3 = scmp.ne.s32.totalorder %s32_s16, %s145_s26  ;;  %p150_p4 = scmp.lt.s32.totalorder %s32_s16, %s32_s16 }
   0xd   :  { %p151_p5 = scmp.lt.s32.totalorder %s149_s27, %s145_s26 }
   0xf   :  { %p152_p6 = por %p151_p5, %p150_p4 }
  0x11   :  { %p153_p7 = pnand %p152_p6, %p146_p3 }
  0x13   :  { %156 = shalt.err (!%p153_p7)
}
  0x14   :  { %34 = dma.hbm_to_vmem [thread:$0]  %s369_s1, 16, %s32_s16, [#allocation6]  }
  0x15   :  { %s157_s6 = scalar_lea.hbm %s368_s0, 512 }
  0x16   :  { %p158_p8 = scmp.ne.s32.totalorder %s368_s0, %s157_s6  ;;  %p161_p9 = scmp.lt.u32.totalorder %s157_s6, %s368_s0 }
  0x18   :  { %p163_p10 = pnand %p161_p9, %p158_p8 }
  0x1a   :  { %166 = shalt.err (!%p163_p10)
}
  0x1b   :  { %s167_s11 = scalar_lea.vmem %s285_s18, 512  ;;  %p172_p12 = scmp.lt.s32.totalorder %s285_s18, %s285_s18 }
  0x1c   :  { %p168_p11 = scmp.ne.s32.totalorder %s285_s18, %s167_s11  ;;  %p173_p13 = scmp.lt.s32.totalorder %s167_s11, %s167_s11 }
  0x1e   :  { %p174_p0 = por %p173_p13, %p172_p12 }
  0x20   :  { %p175_p1 = pnand %p174_p0, %p168_p11 }
  0x22   :  { %178 = shalt.err (!%p175_p1)
}
  0x23   :  { %s255_s1 = smov 128   ;;  %s256_s12 = smov 8  }
  0x24   :  { %24 = dma.hbm_to_vmem [thread:$0]  %s368_s0, 512, %s285_s18, [#allocation3], %s255_s1, %s255_s1, %s256_s12  }
  0x25   :  { %s257_s15 = smov [#allocation7]   ;;  %s258_s17 = smov [#allocation8]  }
  0x26   :  { %s41_s16 = sshll.u32 %s257_s15, 4  ;;  %s50_s19 = sshll.u32 %s258_s17, 4  ;;  %s42_s16 = int_to_ptr.vmem [resolvable:$true] %s41_s16  ;;  %s319_s19 = int_to_ptr.vmem [resolvable:$true] %s50_s19 }
  0x27   :  { %s179_s22 = scalar_lea.hbm %s370_s2, 16 }
  0x28   :  { %p180_p2 = scmp.ne.s32.totalorder %s370_s2, %s179_s22  ;;  %p183_p3 = scmp.lt.u32.totalorder %s179_s22, %s370_s2 }
  0x2a   :  { %p185_p4 = pnand %p183_p3, %p180_p2 }
  0x2c   :  { %188 = shalt.err (!%p185_p4)
}
  0x2d   :  { %s189_s0 = scalar_lea.vmem %s42_s16, 16  ;;  %s193_s18 = scalar_lea.vmem %s42_s16, 32 }
  0x2e   :  { %p190_p5 = scmp.ne.s32.totalorder %s42_s16, %s189_s0  ;;  %p194_p6 = scmp.lt.s32.totalorder %s42_s16, %s42_s16 }
  0x2f   :  { %p195_p7 = scmp.lt.s32.totalorder %s193_s18, %s189_s0 }
  0x31   :  { %p196_p8 = por %p195_p7, %p194_p6 }
  0x33   :  { %p197_p9 = pnand %p196_p8, %p190_p5 }
  0x35   :  { %200 = shalt.err (!%p197_p9)
}
  0x36   :  { %44 = dma.hbm_to_vmem [thread:$0]  %s370_s2, 16, %s42_s16, [#allocation6]  }
  0x37   :  { %s201_s5 = scalar_lea.hbm %s371_s3, 512 }
  0x38   :  { %p202_p10 = scmp.ne.s32.totalorder %s371_s3, %s201_s5  ;;  %p205_p11 = scmp.lt.u32.totalorder %s201_s5, %s371_s3 }
  0x3a   :  { %p207_p12 = pnand %p205_p11, %p202_p10 }
  0x3c   :  { %210 = shalt.err (!%p207_p12)
}
  0x3d   :  { %s211_s10 = scalar_lea.vmem %s319_s19, 512  ;;  %p216_p0 = scmp.lt.s32.totalorder %s319_s19, %s319_s19 }
  0x3e   :  { %p212_p13 = scmp.ne.s32.totalorder %s319_s19, %s211_s10  ;;  %p217_p1 = scmp.lt.s32.totalorder %s211_s10, %s211_s10 }
  0x40   :  { %p218_p2 = por %p217_p1, %p216_p0 }
  0x42   :  { %p219_p3 = pnand %p218_p2, %p212_p13 }
  0x44   :  { %222 = shalt.err (!%p219_p3)
}
  0x45   :  { %56 = dma.hbm_to_vmem [thread:$0]  %s371_s3, 512, %s319_s19, [#allocation9], %s255_s1, %s255_s1, %s256_s12  }
  0x46   :  { %245 = dma.done.wait [#allocation3], 512  }
  0x47   :  { %246 = vsyncadd [#allocation3], 4294966784 }
  0x48   :  { %247 = dma.done.wait [#allocation6], 32  }
  0x49   :  { %248 = vsyncadd [#allocation6], 4294967264 }
  0x4a   :  { %249 = dma.done.wait [#allocation9], 512  }
  0x4b   :  { %250 = vsyncadd [#allocation9], 4294966784  ;;  %v69_v0 = vld [vmem:[#allocation2] sm:$0xff]  ;;  %v70_v4 = vld [vmem:[#allocation2 + $0x8] sm:$0xff]  ;;  %s259_s3 = smov [#allocation10]  }
  0x4c   :  { %v126_v1 = vld [vmem:[#allocation5] ss:$0 sm:$0xff]  ;;  %v127_v2 = vld [vmem:[#allocation7] ss:$0 sm:$0xff]  ;;  %v95_v5 = vld [vmem:[#allocation8] sm:$0xff]  ;;  %s112_s13 = sshll.u32 %s259_s3, 4  ;;  %s113_s13 = int_to_ptr.vmem [resolvable:$true] %s112_s13 }
  0x4d   :  { %v80_v3 = vmul.f32 %v126_v1, %v69_v0  ;;  %v81_v6 = vmul.f32 %v126_v1, %v70_v4  ;;  %v71_v7 = vld [vmem:[#allocation2 + $0x10] sm:$0xff]  ;;  %v72_v8 = vld [vmem:[#allocation2 + $0x18] sm:$0xff]  ;;  %s223_s14 = scalar_lea.vmem %s113_s13, 512  ;;  %p228_p5 = scmp.lt.s32.totalorder %s113_s13, %s113_s13 }
  0x4e   :  { %v96_v10 = vld [vmem:[#allocation8 + $0x8] sm:$0xff]  ;;  %v82_v11 = vmul.f32 %v126_v1, %v71_v7  ;;  %v83_v12 = vmul.f32 %v126_v1, %v72_v8  ;;  %v97_v14 = vld [vmem:[#allocation8 + $0x10] sm:$0xff]  ;;  %v98_v15 = vld [vmem:[#allocation8 + $0x18] sm:$0xff]  ;;  %p224_p4 = scmp.ne.s32.totalorder %s113_s13, %s223_s14  ;;  %p229_p6 = scmp.lt.s32.totalorder %s223_s14, %s223_s14 }
  0x4f   :  { %v91_v9 = vadd.f32 %v127_v2, %v80_v3  ;;  %v92_v13 = vadd.f32 %v127_v2, %v81_v6 }
  0x50   :  { %v93_v17 = vadd.f32 %v127_v2, %v82_v11  ;;  %v94_v18 = vadd.f32 %v127_v2, %v83_v12  ;;  %p230_p7 = por %p229_p6, %p228_p5 }
  0x51   :  { %v99_v16 = vadd.f32 %v95_v5, %v91_v9  ;;  %v100_v19 = vadd.f32 %v96_v10, %v92_v13 }
  0x52   :  { %v101_v20 = vadd.f32 %v97_v14, %v93_v17  ;;  %v102_v21 = vadd.f32 %v98_v15, %v94_v18  ;;  %p231_p8 = pnand %p230_p7, %p224_p4 }
  0x53   :  { %103 = vst [vmem:[#allocation10] sm:$0xff] %v99_v16  ;;  %104 = vst [vmem:[#allocation10 + $0x8] sm:$0xff] %v100_v19 }
  0x54   :  { %105 = vst [vmem:[#allocation10 + $0x10] sm:$0xff] %v101_v20  ;;  %106 = vst [vmem:[#allocation10 + $0x18] sm:$0xff] %v102_v21 }
  0x55   :  { %234 = shalt.err (!%p231_p8)
}
  0x56   :  { %s235_s17 = scalar_lea.hbm %s372_s4, 512 }
  0x57   :  { %p236_p9 = scmp.ne.s32.totalorder %s372_s4, %s235_s17  ;;  %p239_p10 = scmp.lt.u32.totalorder %s235_s17, %s372_s4 }
  0x59   :  { %p241_p11 = pnand %p239_p10, %p236_p9 }
  0x5b   :  { %244 = shalt.err (!%p241_p11)
}
  0x5c   :  { %118 = dma.vmem_to_hbm [thread:$0]  %s113_s13, 512, %s372_s4, [#allocation4], %s255_s1, %s255_s1, %s256_s12  }
  0x5d   :  { %251 = dma.done.wait [#allocation4], 512  }
  0x5e   :  { %252 = vsyncadd [#allocation4], 4294966784 }
  0x5f   :  { %122 = vsyncpa [#allocation3], 1 }
  0x60   :  { %123 = vsyncpa [#allocation6], 1 }
  0x61   :  { %124 = vsyncpa [#allocation9], 1 }
  0x62   :  { %125 = vsyncpa [#allocation4], 1 }

// kernel: basic_block_forward.3
= control target key start
LH: loop header
LB: loop body
LE: loop exit
PB: predicated region body
PF: predicated region fallthrough
CT: control target
= control target key end

     0   :  { %13 = vsyncpa [#allocation3], 0  ;;  %s1282_s0 = inlined_call_operand.hbm [shape: f32[32,128], index: 0, kind: input, shape index: {}]   ;;  %s1283_s1 = inlined_call_operand.hbm [shape: f32[1,128], index: 1, kind: input, shape index: {}]   ;;  %s1284_s2 = inlined_call_operand.hbm [shape: f32[1,128], index: 2, kind: input, shape index: {}]   ;;  %s1285_s3 = inlined_call_operand.hbm [shape: f32[3,128,128], index: 3, kind: input, shape index: {}]   ;;  %s1286_s4 = inlined_call_operand.hbm [shape: f32[32,1], index: 4, kind: input, shape index: {}]   ;;  %s1287_s5 = inlined_call_operand.hbm [shape: f32[32,1], index: 5, kind: input, shape index: {}]   ;;  %s1288_s6 = inlined_call_operand.hbm [shape: f32[32,128], index: 6, kind: output, shape index: {0}]   ;;  %s1289_s7 = inlined_call_operand.hbm [shape: f32[1,8,128], index: 7, kind: output, shape index: {1}]  }
   0x1   :  { %14 = vsyncpa [#allocation6], 0 }
   0x2   :  { %15 = vsyncpa [#allocation9], 0 }
   0x3   :  { %16 = vsyncpa [#allocation12], 0 }
   0x4   :  { %17 = vsyncpa [#allocation4], 0 }
   0x5   :  { %18 = vsyncpa [#allocation15], 0  ;;  %s1078_s24 = smov [#allocation5]   ;;  %s890_s28 = scalar_lea.hbm %s1283_s1, 16 }
   0x6   :  { %s37_s25 = sshll.u32 %s1078_s24, 4  ;;  %p891_p0 = scmp.ne.s32.totalorder %s1283_s1, %s890_s28  ;;  %s38_s25 = int_to_ptr.vmem [resolvable:$true] %s37_s25 }
   0x7   :  { %p894_p1 = scmp.lt.u32.totalorder %s890_s28, %s1283_s1 }
   0x9   :  { %p896_p2 = pnand %p894_p1, %p891_p0 }
   0xb   :  { %899 = shalt.err (!%p896_p2)
}
   0xc   :  { %s900_s10 = scalar_lea.vmem %s38_s25, 16  ;;  %s904_s11 = scalar_lea.vmem %s38_s25, 32 }
   0xd   :  { %p901_p3 = scmp.ne.s32.totalorder %s38_s25, %s900_s10  ;;  %p905_p4 = scmp.lt.s32.totalorder %s38_s25, %s38_s25 }
   0xe   :  { %p906_p5 = scmp.lt.s32.totalorder %s904_s11, %s900_s10 }
  0x10   :  { %p907_p6 = por %p906_p5, %p905_p4 }
  0x12   :  { %p908_p7 = pnand %p907_p6, %p901_p3 }
  0x14   :  { %911 = shalt.err (!%p908_p7)
}
  0x15   :  { %40 = dma.hbm_to_vmem [thread:$0]  %s1283_s1, 16, %s38_s25, [#allocation6]  }
  0x16   :  { %s1079_s14 = smov [#allocation8]   ;;  %s1080_s16 = smov [#allocation2]  }
  0x17   :  { %s56_s15 = sshll.u32 %s1079_s14, 4  ;;  %s24_s17 = sshll.u32 %s1080_s16, 4  ;;  %s57_s15 = int_to_ptr.vmem [resolvable:$true] %s56_s15  ;;  %s25_s17 = int_to_ptr.vmem [resolvable:$true] %s24_s17 }
  0x18   :  { %s912_s20 = scalar_lea.hbm %s1285_s3, 6144 }
  0x19   :  { %p913_p8 = scmp.ne.s32.totalorder %s1285_s3, %s912_s20  ;;  %p916_p9 = scmp.lt.u32.totalorder %s912_s20, %s1285_s3 }
  0x1b   :  { %p918_p10 = pnand %p916_p9, %p913_p8 }
  0x1d   :  { %921 = shalt.err (!%p918_p10)
}
  0x1e   :  { %s922_s1 = scalar_lea.vmem %s57_s15, 6144  ;;  %p927_p12 = scmp.lt.s32.totalorder %s57_s15, %s57_s15 }
  0x1f   :  { %p923_p11 = scmp.ne.s32.totalorder %s57_s15, %s922_s1  ;;  %p928_p13 = scmp.lt.s32.totalorder %s922_s1, %s922_s1 }
  0x21   :  { %p929_p0 = por %p928_p13, %p927_p12 }
  0x23   :  { %p930_p1 = pnand %p929_p0, %p923_p11 }
  0x25   :  { %933 = shalt.err (!%p930_p1)
}
  0x26   :  { %s1081_s25 = smov 128   ;;  %s1082_s26 = smov 8  }
  0x27   :  { %62 = dma.hbm_to_vmem [thread:$0]  %s1285_s3, 6144, %s57_s15, [#allocation9], %s1081_s25, %s1081_s25, %s1082_s26  }
  0x28   :  { %s934_s8 = scalar_lea.hbm %s1282_s0, 512 }
  0x29   :  { %p935_p2 = scmp.ne.s32.totalorder %s1282_s0, %s934_s8  ;;  %p938_p3 = scmp.lt.u32.totalorder %s934_s8, %s1282_s0 }
  0x2b   :  { %p940_p4 = pnand %p938_p3, %p935_p2 }
  0x2d   :  { %943 = shalt.err (!%p940_p4)
}
  0x2e   :  { %s944_s13 = scalar_lea.vmem %s25_s17, 512  ;;  %p949_p6 = scmp.lt.s32.totalorder %s25_s17, %s25_s17 }
  0x2f   :  { %p945_p5 = scmp.ne.s32.totalorder %s25_s17, %s944_s13  ;;  %p950_p7 = scmp.lt.s32.totalorder %s944_s13, %s944_s13 }
  0x31   :  { %p951_p8 = por %p950_p7, %p949_p6 }
  0x33   :  { %p952_p9 = pnand %p951_p8, %p945_p5 }
  0x35   :  { %955 = shalt.err (!%p952_p9)
}
  0x36   :  { %30 = dma.hbm_to_vmem [thread:$0]  %s1282_s0, 512, %s25_s17, [#allocation3], %s1081_s25, %s1081_s25, %s1082_s26  }
  0x37   :  { %s1083_s15 = smov [#allocation7]   ;;  %s1084_s18 = smov [#allocation10]  }
  0x38   :  { %s47_s16 = sshll.u32 %s1083_s15, 4  ;;  %s68_s19 = sshll.u32 %s1084_s18, 4  ;;  %s48_s16 = int_to_ptr.vmem [resolvable:$true] %s47_s16  ;;  %s69_s19 = int_to_ptr.vmem [resolvable:$true] %s68_s19 }
  0x39   :  { %s956_s22 = scalar_lea.hbm %s1284_s2, 16 }
  0x3a   :  { %p957_p10 = scmp.ne.s32.totalorder %s1284_s2, %s956_s22  ;;  %p960_p11 = scmp.lt.u32.totalorder %s956_s22, %s1284_s2 }
  0x3c   :  { %p962_p12 = pnand %p960_p11, %p957_p10 }
  0x3e   :  { %965 = shalt.err (!%p962_p12)
}
  0x3f   :  { %s966_s0 = scalar_lea.vmem %s48_s16, 16  ;;  %s970_s17 = scalar_lea.vmem %s48_s16, 32 }
  0x40   :  { %p967_p13 = scmp.ne.s32.totalorder %s48_s16, %s966_s0  ;;  %p971_p0 = scmp.lt.s32.totalorder %s48_s16, %s48_s16 }
  0x41   :  { %p972_p1 = scmp.lt.s32.totalorder %s970_s17, %s966_s0 }
  0x43   :  { %p973_p2 = por %p972_p1, %p971_p0 }
  0x45   :  { %p974_p3 = pnand %p973_p2, %p967_p13 }
  0x47   :  { %977 = shalt.err (!%p974_p3)
}
  0x48   :  { %50 = dma.hbm_to_vmem [thread:$0]  %s1284_s2, 16, %s48_s16, [#allocation6]  }
  0x49   :  { %s978_s9 = scalar_lea.hbm %s1286_s4, 512 }
  0x4a   :  { %p979_p4 = scmp.ne.s32.totalorder %s1286_s4, %s978_s9  ;;  %p982_p5 = scmp.lt.u32.totalorder %s978_s9, %s1286_s4 }
  0x4c   :  { %p984_p6 = pnand %p982_p5, %p979_p4 }
  0x4e   :  { %987 = shalt.err (!%p984_p6)
}
  0x4f   :  { %s988_s3 = scalar_lea.vmem %s69_s19, 512  ;;  %p993_p8 = scmp.lt.s32.totalorder %s69_s19, %s69_s19 }
  0x50   :  { %p989_p7 = scmp.ne.s32.totalorder %s69_s19, %s988_s3  ;;  %p994_p9 = scmp.lt.s32.totalorder %s988_s3, %s988_s3 }
  0x52   :  { %p995_p10 = por %p994_p9, %p993_p8 }
  0x54   :  { %p996_p11 = pnand %p995_p10, %p989_p7 }
  0x56   :  { %999 = shalt.err (!%p996_p11)
}
  0x57   :  { %74 = dma.hbm_to_vmem [thread:$0]  %s1286_s4, 512, %s69_s19, [#allocation9], %s1081_s25, %s1081_s25, %s1082_s26  }
  0x58   :  { %s1085_s15 = smov [#allocation11]   ;;  %s1000_s21 = scalar_lea.hbm %s1287_s5, 512 }
  0x59   :  { %s80_s16 = sshll.u32 %s1085_s15, 4  ;;  %p1001_p12 = scmp.ne.s32.totalorder %s1287_s5, %s1000_s21  ;;  %s81_s16 = int_to_ptr.vmem [resolvable:$true] %s80_s16 }
  0x5a   :  { %p1004_p13 = scmp.lt.u32.totalorder %s1000_s21, %s1287_s5 }
  0x5c   :  { %p1006_p0 = pnand %p1004_p13, %p1001_p12 }
  0x5e   :  { %1009 = shalt.err (!%p1006_p0)
}
  0x5f   :  { %s1010_s27 = scalar_lea.vmem %s81_s16, 512  ;;  %p1015_p2 = scmp.lt.s32.totalorder %s81_s16, %s81_s16 }
  0x60   :  { %p1011_p1 = scmp.ne.s32.totalorder %s81_s16, %s1010_s27  ;;  %p1016_p3 = scmp.lt.s32.totalorder %s1010_s27, %s1010_s27 }
  0x62   :  { %p1017_p4 = por %p1016_p3, %p1015_p2 }
  0x64   :  { %p1018_p5 = pnand %p1017_p4, %p1011_p1 }
  0x66   :  { %1021 = shalt.err (!%p1018_p5)
}
  0x67   :  { %86 = dma.hbm_to_vmem [thread:$0]  %s1287_s5, 512, %s81_s16, [#allocation12], %s1081_s25, %s1081_s25, %s1082_s26  }
  0x68   :  { %1066 = dma.done.wait [#allocation3], 512  }
  0x69   :  { %1067 = vsyncadd [#allocation3], 4294966784 }
  0x6a   :  { %1068 = dma.done.wait [#allocation6], 32  }
  0x6b   :  { %1069 = vsyncadd [#allocation6], 4294967264 }
  0x6c   :  { %1070 = dma.done.wait [#allocation9], 6656  }
  0x6d   :  { %1071 = vsyncadd [#allocation9], 4294960640 }
  0x6e   :  { %1072 = dma.done.wait [#allocation12], 512  }
  0x6f   :  { %1073 = vsyncadd [#allocation12], 4294966784  ;;  %v1086_v0 = vmov 0   ;;  %v142_v1 = vld [vmem:[#allocation10] sm:$0xff]  ;;  %v144_v2 = vld [vmem:[#allocation10 + $0x10] sm:$0xff]  ;;  %v135_v31 = vlaneseq  ;;  %s1087_s5 = smov [#allocation13]  }
  0x70   :  { %888 = vset.pattern.permute.xlu0 %v1086_v0  ;;  %889 = vset.pattern.permute.xlu1 %v1086_v0  ;;  %v143_v3 = vld [vmem:[#allocation10 + $0x8] sm:$0xff]  ;;  %v145_v4 = vld [vmem:[#allocation10 + $0x18] sm:$0xff]  ;;  %v224_v5 = vld [vmem:[#allocation8 + $0x80] sm:$0xff]  ;;  %s552_s0 = sshll.u32 %s1087_s5, 4  ;;  %s553_s0 = int_to_ptr.vmem [resolvable:$true] %s552_s0 }
  0x71   :  { %148 = vperm.xlu0 %888, %v142_v1   ;;  %158 = vperm.xlu1 %889, %v144_v2   ;;  %v225_v6 = vld [vmem:[#allocation8 + $0x88] sm:$0xff]  ;;  %v226_v7 = vld [vmem:[#allocation8 + $0x90] sm:$0xff]  ;;  %v227_v8 = vld [vmem:[#allocation8 + $0x98] sm:$0xff]  ;;  %v136_v43 = vshrl.u32 %v135_v31, 7  ;;  %s1022_s17 = scalar_lea.vmem %s553_s0, 512  ;;  %p1027_p7 = scmp.lt.s32.totalorder %s553_s0, %s553_s0 }
  0x72   :  { %v179_v9 = vld [vmem:[#allocation11] sm:$0xff]  ;;  %v757_v10 = vpack.c.bf16 %v225_v6, %v224_v5  ;;  %v761_v11 = vpack.c.bf16 %v227_v8, %v226_v7  ;;  %v229_v14 = vld [vmem:[#allocation8 + $0xa8] sm:$0xff]  ;;  %v209_v18 = vld [vmem:[#allocation8 + $0x10] sm:$0xff]  ;;  %p1023_p6 = scmp.ne.s32.totalorder %s553_s0, %s1022_s17  ;;  %p1028_p8 = scmp.lt.s32.totalorder %s1022_s17, %s1022_s17 }
  0x73   :  { %v207_v12 = vld [vmem:[#allocation8] sm:$0xff]  ;;  %v208_v15 = vld [vmem:[#allocation8 + $0x8] sm:$0xff]  ;;  %v210_v19 = vld [vmem:[#allocation8 + $0x18] sm:$0xff]  ;;  %vm174_vm0 = vcmp.lt.s32.totalorder %v136_v43, 7  ;;  %vm137_vm1 = vcmp.lt.s32.totalorder %v136_v43, 1 }
  0x74   :  { %v228_v13 = vld [vmem:[#allocation8 + $0xa0] sm:$0xff]  ;;  %v180_v16 = vld [vmem:[#allocation11 + $0x8] sm:$0xff]  ;;  %758 = vmatprep.subr.bf16.mxu1 %v757_v10  ;;  %v789_v17 = vpack.c.bf16 %v208_v15, %v207_v12  ;;  %v793_v20 = vpack.c.bf16 %v210_v19, %v209_v18  ;;  %v230_v24 = vld [vmem:[#allocation8 + $0xb0] sm:$0xff]  ;;  %p1029_p9 = por %p1028_p8, %p1027_p7 }
  0x75   :  { %153 = vperm.xlu0 %888, %v143_v3   ;;  %163 = vperm.xlu1 %889, %v145_v4   ;;  %v765_v21 = vpack.c.bf16 %v229_v14, %v228_v13  ;;  %v211_v22 = vld [vmem:[#allocation8 + $0x20] sm:$0xff]  ;;  %v212_v23 = vld [vmem:[#allocation8 + $0x28] sm:$0xff]  ;;  %v231_v25 = vld [vmem:[#allocation8 + $0xb8] sm:$0xff] }
  0x76   :  { %760 = vmatpush3.bf16.msra.mxu1 %v757_v10  ;;  %790 = vmatprep.subr.bf16.mxu0 %v789_v17  ;;  %v181_v26 = vld [vmem:[#allocation11 + $0x10] sm:$0xff]  ;;  %v182_v27 = vld [vmem:[#allocation11 + $0x18] sm:$0xff]  ;;  %v797_v28 = vpack.c.bf16 %v212_v23, %v211_v22  ;;  %v769_v32 = vpack.c.bf16 %v231_v25, %v230_v24  ;;  %v232_v36 = vld [vmem:[#allocation8 + $0xc0] sm:$0xff]  ;;  %p1030_p10 = pnand %p1029_p9, %p1023_p6 }
  0x77   :  { %762 = vmatprep.subr.bf16.mxu1 %v761_v11  ;;  %792 = vmatpush3.bf16.msra.mxu0 %v789_v17  ;;  %v213_v29 = vld [vmem:[#allocation8 + $0x30] sm:$0xff]  ;;  %v214_v30 = vld [vmem:[#allocation8 + $0x38] sm:$0xff]  ;;  %v233_v37 = vld [vmem:[#allocation8 + $0xc8] sm:$0xff] }
  0x78   :  { %794 = vmatprep.subr.bf16.mxu0 %v793_v20  ;;  %v105_v33 = vld [vmem:[#allocation2] sm:$0xff]  ;;  %v106_v39 = vld [vmem:[#allocation2 + $0x8] sm:$0xff]  ;;  %v801_v41 = vpack.c.bf16 %v214_v30, %v213_v29  ;;  %v773_v44 = vpack.c.bf16 %v233_v37, %v232_v36  ;;  %v108_v48 = vld [vmem:[#allocation2 + $0x18] sm:$0xff] }
  0x79   :  { %185 = vperm.xlu0 %888, %v179_v9   ;;  %190 = vperm.xlu1 %889, %v180_v16   ;;  %v581_v34 = vld [vmem:[#allocation5] ss:$0 sm:$0xff]  ;;  %v582_v35 = vld [vmem:[#allocation7] ss:$0 sm:$0xff]  ;;  %v215_v45 = vld [vmem:[#allocation8 + $0x40] sm:$0xff] }
  0x7a   :  { %764 = vmatpush3.bf16.msra.mxu1 %v761_v11  ;;  %v116_v38 = vmul.f32 %v581_v34, %v105_v33  ;;  %v117_v40 = vmul.f32 %v581_v34, %v106_v39  ;;  %v216_v46 = vld [vmem:[#allocation8 + $0x48] sm:$0xff]  ;;  %v234_v49 = vld [vmem:[#allocation8 + $0xd0] sm:$0xff]  ;;  %v235_v50 = vld [vmem:[#allocation8 + $0xd8] sm:$0xff]  ;;  %v119_v51 = vmul.f32 %v581_v34, %v108_v48 }
  0x7b   :  { %766 = vmatprep.subr.bf16.mxu1 %v765_v21  ;;  %796 = vmatpush3.bf16.msra.mxu0 %v793_v20  ;;  %v107_v52 = vld [vmem:[#allocation2 + $0x10] sm:$0xff]  ;;  %v236_v58 = vld [vmem:[#allocation8 + $0xe0] sm:$0xff]  ;;  %v805_v59 = vpack.c.bf16 %v216_v46, %v215_v45  ;;  %v777_v61 = vpack.c.bf16 %v235_v50, %v234_v49  ;;  %v218_v0 = vld [vmem:[#allocation8 + $0x58] sm:$0xff] }
  0x7c   :  { %798 = vmatprep.subr.bf16.mxu0 %v797_v28  ;;  %v127_v42 = vadd.f32 %v582_v35, %v116_v38  ;;  %v1213_v47 = vadd.f32 %v582_v35, %v117_v40  ;;  %v118_v55 = vmul.f32 %v581_v34, %v107_v52  ;;  %v1217_v60 = vadd.f32 %v582_v35, %v119_v51  ;;  %v237_v62 = vld [vmem:[#allocation8 + $0xe8] sm:$0xff]  ;;  %v217_v63 = vld [vmem:[#allocation8 + $0x50] sm:$0xff]  ;;  %v219_v11 = vld [vmem:[#allocation8 + $0x60] sm:$0xff] }
  0x7d   :  { %195 = vperm.xlu0 %888, %v181_v26   ;;  %200 = vperm.xlu1 %889, %v182_v27   ;;  %v781_v8 = vpack.c.bf16 %v237_v62, %v236_v58  ;;  %v809_v9 = vpack.c.bf16 %v218_v0, %v217_v63  ;;  %v220_v12 = vld [vmem:[#allocation8 + $0x68] sm:$0xff]  ;;  %v238_v17 = vld [vmem:[#allocation8 + $0xf0] sm:$0xff]  ;;  %v239_v18 = vld [vmem:[#allocation8 + $0xf8] sm:$0xff] }
  0x7e   :  { %768 = vmatpush3.bf16.msra.mxu1 %v765_v21  ;;  %675 = vmatprep.mubr.f32.mxu1 %v127_v42  ;;  %v170_v53 = vrot.slane %v127_v42, 1  ;;  %v131_v54 = vrot.slane %v127_v42, 7  ;;  %v132_v56 = vrot.slane %v1213_v47, 7  ;;  %v171_v57 = vrot.slane %v1213_v47, 1  ;;  %v221_v22 = vld [vmem:[#allocation8 + $0x70] sm:$0xff]  ;;  %v222_v23 = vld [vmem:[#allocation8 + $0x78] sm:$0xff] }
  0x7f   :  { %770 = vmatprep.subr.bf16.mxu1 %v769_v32  ;;  %800 = vmatpush3.bf16.msra.mxu0 %v797_v28  ;;  %v129_v1 = vadd.f32 %v582_v35, %v118_v55  ;;  %v134_v4 = vrot.slane %v1217_v60, 7  ;;  %v173_v5 = vrot.slane %v1217_v60, 1  ;;  %v813_v20 = vpack.c.bf16 %v220_v12, %v219_v11  ;;  %v411_v24 = vld [vmem:[#allocation8 + $0x100] sm:$0xff]  ;;  %v412_v25 = vld [vmem:[#allocation8 + $0x108] sm:$0xff]  ;;  %v413_v28 = vld [vmem:[#allocation8 + $0x110] sm:$0xff] }
  0x80   :  { %802 = vmatprep.subr.bf16.mxu0 %v801_v41  ;;  %v1220_v2 = vsel %vm137_vm1, %v131_v54, %v132_v56  ;;  %v1223_v3 = vsel %vm174_vm0, %v170_v53, %v171_v57  ;;  %v785_v21 = vpack.c.bf16 %v239_v18, %v238_v17  ;;  %v817_v26 = vpack.c.bf16 %v222_v23, %v221_v22  ;;  %v414_v29 = vld [vmem:[#allocation8 + $0x118] sm:$0xff]  ;;  %v415_v31 = vld [vmem:[#allocation8 + $0x120] sm:$0xff]  ;;  %v417_v34 = vld [vmem:[#allocation8 + $0x130] sm:$0xff] }
  0x81   :  { %v133_v6 = vrot.slane %v129_v1, 7  ;;  %v172_v7 = vrot.slane %v129_v1, 1  ;;  %v1228_v10 = vsel %vm137_vm1, %v134_v4, %v131_v54  ;;  %v1243_v19 = vsel %vm174_vm0, %v173_v5, %v170_v53  ;;  %v418_v35 = vld [vmem:[#allocation8 + $0x138] sm:$0xff]  ;;  %v419_v37 = vld [vmem:[#allocation8 + $0x140] sm:$0xff]  ;;  %v420_v38 = vld [vmem:[#allocation8 + $0x148] sm:$0xff] }
  0x82   :  { %772 = vmatpush3.bf16.msra.mxu1 %v769_v32  ;;  %v821_v27 = vpack.c.bf16 %v412_v25, %v411_v24  ;;  %v825_v30 = vpack.c.bf16 %v414_v29, %v413_v28  ;;  %v416_v32 = vld [vmem:[#allocation8 + $0x128] sm:$0xff]  ;;  %v833_v36 = vpack.c.bf16 %v418_v35, %v417_v34  ;;  %v837_v39 = vpack.c.bf16 %v420_v38, %v419_v37  ;;  %v421_v40 = vld [vmem:[#allocation8 + $0x150] sm:$0xff]  ;;  %v423_v43 = vld [vmem:[#allocation8 + $0x160] sm:$0xff] }
  0x83   :  { %774 = vmatprep.subr.bf16.mxu1 %v773_v44  ;;  %804 = vmatpush3.bf16.msra.mxu0 %v801_v41  ;;  %v1231_v13 = vsel %vm137_vm1, %v132_v56, %v133_v6  ;;  %v1234_v14 = vsel %vm137_vm1, %v133_v6, %v134_v4  ;;  %v1237_v15 = vsel %vm174_vm0, %v172_v7, %v173_v5  ;;  %v422_v41 = vld [vmem:[#allocation8 + $0x158] sm:$0xff]  ;;  %v425_v46 = vld [vmem:[#allocation8 + $0x170] sm:$0xff] }
  0x84   :  { %806 = vmatprep.subr.bf16.mxu0 %v805_v59  ;;  %v1240_v16 = vsel %vm174_vm0, %v171_v57, %v172_v7  ;;  %v829_v33 = vpack.c.bf16 %v416_v32, %v415_v31  ;;  %v841_v42 = vpack.c.bf16 %v422_v41, %v421_v40 }
  0x86   :  { %776 = vmatpush3.bf16.msra.mxu1 %v773_v44  ;;  %v424_v44 = vld [vmem:[#allocation8 + $0x168] sm:$0xff] }
  0x87   :  { %778 = vmatprep.subr.bf16.mxu1 %v777_v61  ;;  %808 = vmatpush3.bf16.msra.mxu0 %v805_v59  ;;  %v845_v45 = vpack.c.bf16 %v424_v44, %v423_v43 }
  0x88   :  { %810 = vmatprep.subr.bf16.mxu0 %v809_v9 }
  0x8a   :  { %780 = vmatpush3.bf16.msra.mxu1 %v777_v61 }
  0x8b   :  { %782 = vmatprep.subr.bf16.mxu1 %v781_v8  ;;  %812 = vmatpush3.bf16.msra.mxu0 %v809_v9 }
  0x8c   :  { %814 = vmatprep.subr.bf16.mxu0 %v813_v20 }
  0x8e   :  { %784 = vmatpush3.bf16.msra.mxu1 %v781_v8 }
  0x8f   :  { %786 = vmatprep.subr.bf16.mxu1 %v785_v21  ;;  %816 = vmatpush3.bf16.msra.mxu0 %v813_v20 }
  0x90   :  { %818 = vmatprep.subr.bf16.mxu0 %v817_v26 }
  0x92   :  { %788 = vmatpush3.bf16.msra.mxu1 %v785_v21 }
  0x93   :  { %853 = vmatprep.subr.bf16.mxu1 %v821_v27  ;;  %820 = vmatpush3.bf16.msra.mxu0 %v817_v26 }
  0x94   :  { %822 = vmatprep.subr.bf16.mxu0 %v821_v27 }
  0x95   :  { %676 = vmatmul.mubr.f32.vlgmr.msra.gmra.mrb[0].mxu1 %v1213_v47  ;;  %v426_v47 = vld [vmem:[#allocation8 + $0x178] sm:$0xff] }
  0x96   :  { %861 = vmatpush3.bf16.msra.mxu1 %v821_v27  ;;  %678 = vmatprep.mubr.f32.mxu1 %v129_v1  ;;  %v849_v48 = vpack.c.bf16 %v426_v47, %v425_v46 }
  0x97   :  { %854 = vmatprep.subr.bf16.mxu1 %v825_v30 }
  0x99   :  { %679 = vmatmul.mubr.f32.gmra.mrb[2].mxu1 %v1217_v60 }
  0x9a   :  { %862 = vmatpush3.bf16.msra.mxu1 %v825_v30 }
  0x9b   :  { %855 = vmatprep.subr.bf16.mxu1 %v829_v33 }
  0x9e   :  { %863 = vmatpush3.bf16.msra.mxu1 %v829_v33 }
  0x9f   :  { %856 = vmatprep.subr.bf16.mxu1 %v833_v36 }
  0xa2   :  { %864 = vmatpush3.bf16.msra.mxu1 %v833_v36 }
  0xa3   :  { %857 = vmatprep.subr.bf16.mxu1 %v837_v39 }
  0xa6   :  { %865 = vmatpush3.bf16.msra.mxu1 %v837_v39 }
  0xa7   :  { %858 = vmatprep.subr.bf16.mxu1 %v841_v42 }
  0xaa   :  { %866 = vmatpush3.bf16.msra.mxu1 %v841_v42 }
  0xab   :  { %859 = vmatprep.subr.bf16.mxu1 %v845_v45 }
  0xae   :  { %867 = vmatpush3.bf16.msra.mxu1 %v845_v45 }
  0xaf   :  { %860 = vmatprep.subr.bf16.mxu1 %v849_v48 }
  0xb2   :  { %868 = vmatpush3.bf16.msra.mxu1 %v849_v48 }
  0xf0   :  { %v149_v49 = vpop.permute.xlu0 %148  ;;  %v159_v50 = vpop.permute.xlu1 %158 }
  0xf1   :  { %v166_v51 = vmul.f32 %v149_v49, %v1228_v10  ;;  %v168_v52 = vmul.f32 %v159_v50, %v1231_v13 }
  0xf3   :  { %713 = vmatprep.mubr.f32.mxu0 %v166_v51 }
  0xf4   :  { %v154_v53 = vpop.permute.xlu0 %153  ;;  %v164_v54 = vpop.permute.xlu1 %163 }
  0xf5   :  { %v167_v55 = vmul.f32 %v154_v53, %v1220_v2  ;;  %v169_v56 = vmul.f32 %v164_v54, %v1234_v14 }
  0xf7   :  { %714 = vmatmul.mubr.f32.vlgmr.msra.gmra.mrb[0].mxu0 %v167_v55 }
  0xf8   :  { %824 = vmatpush3.bf16.msra.mxu0 %v821_v27  ;;  %v186_v57 = vpop.permute.xlu0 %185  ;;  %716 = vmatprep.mubr.f32.mxu0 %v168_v52  ;;  %v191_v58 = vpop.permute.xlu1 %190 }
  0xf9   :  { %v203_v59 = vmul.f32 %v186_v57, %v1223_v3  ;;  %826 = vmatprep.subr.bf16.mxu0 %v825_v30  ;;  %v204_v0 = vmul.f32 %v191_v58, %v1240_v16 }
  0xfb   :  { %717 = vmatmul.mubr.f32.gmra.mrb[2].mxu0 %v169_v56 }
  0xfc   :  { %828 = vmatpush3.bf16.msra.mxu0 %v825_v30  ;;  %v196_v60 = vpop.permute.xlu0 %195  ;;  %751 = vmatprep.mubr.f32.mxu0 %v203_v59  ;;  %v201_v61 = vpop.permute.xlu1 %200 }
  0xfd   :  { %v205_v62 = vmul.f32 %v196_v60, %v1237_v15  ;;  %830 = vmatprep.subr.bf16.mxu0 %v829_v33  ;;  %v206_v63 = vmul.f32 %v201_v61, %v1243_v19 }
  0xff   :  { %754 = vmatprep.mubr.f32.mxu1 %v205_v62 }
 0x100   :  { %832 = vmatpush3.bf16.msra.mxu0 %v829_v33  ;;  %755 = vmatmul.mubr.f32.vlgmr.msra.gmra.mrb[4].mxu1 %v206_v63 }
 0x101   :  { %834 = vmatprep.subr.bf16.mxu0 %v833_v36 }
 0x104   :  { %836 = vmatpush3.bf16.msra.mxu0 %v833_v36 }
 0x105   :  { %838 = vmatprep.subr.bf16.mxu0 %v837_v39 }
 0x108   :  { %840 = vmatpush3.bf16.msra.mxu0 %v837_v39 }
 0x109   :  { %842 = vmatprep.subr.bf16.mxu0 %v841_v42 }
 0x10c   :  { %844 = vmatpush3.bf16.msra.mxu0 %v841_v42 }
 0x10d   :  { %846 = vmatprep.subr.bf16.mxu0 %v845_v45 }
 0x110   :  { %848 = vmatpush3.bf16.msra.mxu0 %v845_v45 }
 0x111   :  { %850 = vmatprep.subr.bf16.mxu0 %v849_v48 }
 0x114   :  { %852 = vmatpush3.bf16.msra.mxu0 %v849_v48 }
 0x117   :  { %752 = vmatmul.mubr.f32.vlgmr.msra.gmra.mrb[0].mxu0 %v204_v0 }
 0x168   :  { %v677_v1 = vpop.f32.mrb[0].mxu1 }
 0x169   :  { %v306_v2 = vpop.f32.mrb[1].mxu1 }
 0x16c   :  { %v680_v3 = vpop.f32.mrb[2].mxu1 }
 0x16d   :  { %v316_v4 = vpop.f32.mrb[3].mxu1 }
 0x1ce   :  { %v718_v5 = vpop.f32.mrb[2].mxu0 }
 0x1cf   :  { %v407_v6 = vadd.f32 %v718_v5, %v680_v3  ;;  %v401_v7 = vpop.f32.mrb[3].mxu0 }
 0x1d0   :  { %v402_v8 = vadd.f32 %v401_v7, %v316_v4 }
 0x1d3   :  { %v756_v9 = vpop.f32.mrb[4].mxu1 }
 0x1d4   :  { %v515_v10 = vadd.f32 %v756_v9, %v407_v6  ;;  %v503_v11 = vpop.f32.mrb[5].mxu1 }
 0x1d5   :  { %v514_v12 = vadd.f32 %v503_v11, %v402_v8 }
 0x1d6   :  { %519 = vst [vmem:[#allocation13 + $0x18] sm:$0xff] %v515_v10 }
 0x1d7   :  { %518 = vst [vmem:[#allocation13 + $0x10] sm:$0xff] %v514_v12 }
 0x1ea   :  { %v753_v13 = vpop.f32.mrb[0].mxu0 }
 0x1eb   :  { %v869_v14 = vadd.f32 %v753_v13, %v677_v1  ;;  %v493_v15 = vpop.f32.mrb[1].mxu0 }
 0x1ec   :  { %v870_v16 = vadd.f32 %v493_v15, %v306_v2 }
 0x1ed   :  { %517 = vst [vmem:[#allocation13 + $0x8] sm:$0xff] %v869_v14  ;;  %v530_v17 = vmul.f32 %v869_v14, %v869_v14 }
 0x1ee   :  { %516 = vst [vmem:[#allocation13] sm:$0xff] %v870_v16  ;;  %v520_v18 = vadd.f32 %v870_v16, %v869_v14  ;;  %v529_v19 = vmul.f32 %v870_v16, %v870_v16 }
 0x1ef   :  { %1033 = shalt.err (!%p1030_p10)
}
 0x1f0   :  { %s1034_s30 = scalar_lea.hbm %s1288_s6, 512 }
 0x1f1   :  { %p1035_p11 = scmp.ne.s32.totalorder %s1288_s6, %s1034_s30  ;;  %p1038_p12 = scmp.lt.u32.totalorder %s1034_s30, %s1288_s6 }
 0x1f3   :  { %p1040_p13 = pnand %p1038_p12, %p1035_p11 }
 0x1f5   :  { %1043 = shalt.err (!%p1040_p13)
}
 0x1f6   :  { %558 = dma.vmem_to_hbm [thread:$0]  %s553_s0, 512, %s1288_s6, [#allocation4], %s1081_s25, %s1081_s25, %s1082_s26   ;;  %v531_v20 = vmul.f32 %v514_v12, %v514_v12  ;;  %v521_v21 = vadd.f32 %v520_v18, %v514_v12  ;;  %v533_v22 = vadd.f32 %v530_v17, %v529_v19  ;;  %v532_v23 = vmul.f32 %v515_v10, %v515_v10 }
 0x1f7   :  { %vm542_vm2 = vcmask 1040384   ;;  %s1088_s3 = smov [#allocation14]   ;;  %vm544_vm3 = vcmask 1041408  }
 0x1f8   :  { %v522_v24 = vadd.f32 %v521_v21, %v515_v10  ;;  %v534_v25 = vadd.f32 %v533_v22, %v531_v20  ;;  %s565_s6 = sshll.u32 %s1088_s3, 4  ;;  %s566_s6 = int_to_ptr.vmem [resolvable:$true] %s565_s6 }
 0x1f9   :  { %s1044_s25 = scalar_lea.vmem %s566_s6, 128  ;;  %p1049_p1 = scmp.lt.s32.totalorder %s566_s6, %s566_s6 }
 0x1fa   :  { %v523_v26 = vrot.slane %v522_v24, 4  ;;  %v535_v27 = vadd.f32 %v534_v25, %v532_v23  ;;  %p1045_p0 = scmp.ne.s32.totalorder %s566_s6, %s1044_s25  ;;  %p1050_p2 = scmp.lt.s32.totalorder %s1044_s25, %s1044_s25 }
 0x1fc   :  { %v524_v28 = vadd.f32 %v523_v26, %v522_v24  ;;  %v536_v29 = vrot.slane %v535_v27, 4  ;;  %p1051_p3 = por %p1050_p2, %p1049_p1 }
 0x1fe   :  { %v525_v30 = vrot.slane %v524_v28, 2  ;;  %v537_v31 = vadd.f32 %v536_v29, %v535_v27  ;;  %p1052_p4 = pnand %p1051_p3, %p1045_p0 }
 0x200   :  { %v526_v32 = vadd.f32 %v525_v30, %v524_v28  ;;  %v538_v33 = vrot.slane %v537_v31, 2 }
 0x202   :  { %v527_v34 = vrot.slane %v526_v32, 1  ;;  %v539_v35 = vadd.f32 %v538_v33, %v537_v31 }
 0x204   :  { %v540_v36 = vrot.slane %v539_v35, 1  ;;  %v528_v37 = vadd.f32 %v527_v34, %v526_v32 }
 0x206   :  { %v541_v38 = vadd.f32 %v540_v36, %v539_v35 }
 0x208   :  { %v543_v39 = vsel %vm542_vm2, %v528_v37, %v541_v38 }
 0x209   :  { %v545_v40 = vsel %vm544_vm3, %v543_v39, 0.0 }
 0x20a   :  { %546 = vst [vmem:[#allocation14] sm:$0xff] %v545_v40 }
 0x20b   :  { %1055 = shalt.err (!%p1052_p4)
}
 0x20c   :  { %s1056_s14 = scalar_lea.hbm %s1289_s7, 128 }
 0x20d   :  { %p1057_p5 = scmp.ne.s32.totalorder %s1289_s7, %s1056_s14  ;;  %p1060_p6 = scmp.lt.u32.totalorder %s1056_s14, %s1289_s7 }
 0x20f   :  { %p1062_p7 = pnand %p1060_p6, %p1057_p5 }
 0x211   :  { %1065 = shalt.err (!%p1062_p7)
}
 0x212   :  { %568 = dma.vmem_to_hbm [thread:$0]  %s566_s6, 128, %s1289_s7, [#allocation15]  }
 0x213   :  { %1074 = dma.done.wait [#allocation4], 512  }
 0x214   :  { %1075 = vsyncadd [#allocation4], 4294966784 }
 0x215   :  { %1076 = dma.done.wait [#allocation15], 128  }
 0x216   :  { %1077 = vsyncadd [#allocation15], 4294967168 }
 0x217   :  { %575 = vsyncpa [#allocation3], 1 }
 0x218   :  { %576 = vsyncpa [#allocation6], 1 }
 0x219   :  { %577 = vsyncpa [#allocation9], 1 }
 0x21a   :  { %578 = vsyncpa [#allocation12], 1 }
 0x21b   :  { %579 = vsyncpa [#allocation4], 1 }
 0x21c   :  { %580 = vsyncpa [#allocation15], 1 }

// kernel: basic_block_forward.4
= control target key start
LH: loop header
LB: loop body
LE: loop exit
PB: predicated region body
PF: predicated region fallthrough
CT: control target
= control target key end

     0   :  { %13 = vsyncpa [#allocation3], 0  ;;  %s1281_s0 = inlined_call_operand.hbm [shape: f32[32,128], index: 0, kind: input, shape index: {}]   ;;  %s1282_s1 = inlined_call_operand.hbm [shape: f32[1,128], index: 1, kind: input, shape index: {}]   ;;  %s1283_s2 = inlined_call_operand.hbm [shape: f32[1,128], index: 2, kind: input, shape index: {}]   ;;  %s1284_s3 = inlined_call_operand.hbm [shape: f32[3,128,128], index: 3, kind: input, shape index: {}]   ;;  %s1285_s4 = inlined_call_operand.hbm [shape: f32[32,1], index: 4, kind: input, shape index: {}]   ;;  %s1286_s5 = inlined_call_operand.hbm [shape: f32[32,1], index: 5, kind: input, shape index: {}]   ;;  %s1287_s6 = inlined_call_operand.hbm [shape: f32[32,128], index: 6, kind: output, shape index: {0}]   ;;  %s1288_s7 = inlined_call_operand.hbm [shape: f32[1,8,128], index: 7, kind: output, shape index: {1}]  }
   0x1   :  { %14 = vsyncpa [#allocation6], 0 }
   0x2   :  { %15 = vsyncpa [#allocation9], 0 }
   0x3   :  { %16 = vsyncpa [#allocation12], 0 }
   0x4   :  { %17 = vsyncpa [#allocation4], 0 }
   0x5   :  { %18 = vsyncpa [#allocation15], 0  ;;  %s1082_s24 = smov [#allocation5]   ;;  %s894_s28 = scalar_lea.hbm %s1282_s1, 16 }
   0x6   :  { %s37_s25 = sshll.u32 %s1082_s24, 4  ;;  %p895_p0 = scmp.ne.s32.totalorder %s1282_s1, %s894_s28  ;;  %s38_s25 = int_to_ptr.vmem [resolvable:$true] %s37_s25 }
   0x7   :  { %p898_p1 = scmp.lt.u32.totalorder %s894_s28, %s1282_s1 }
   0x9   :  { %p900_p2 = pnand %p898_p1, %p895_p0 }
   0xb   :  { %903 = shalt.err (!%p900_p2)
}
   0xc   :  { %s904_s10 = scalar_lea.vmem %s38_s25, 16  ;;  %s908_s11 = scalar_lea.vmem %s38_s25, 32 }
   0xd   :  { %p905_p3 = scmp.ne.s32.totalorder %s38_s25, %s904_s10  ;;  %p909_p4 = scmp.lt.s32.totalorder %s38_s25, %s38_s25 }
   0xe   :  { %p910_p5 = scmp.lt.s32.totalorder %s908_s11, %s904_s10 }
  0x10   :  { %p911_p6 = por %p910_p5, %p909_p4 }
  0x12   :  { %p912_p7 = pnand %p911_p6, %p905_p3 }
  0x14   :  { %915 = shalt.err (!%p912_p7)
}
  0x15   :  { %40 = dma.hbm_to_vmem [thread:$0]  %s1282_s1, 16, %s38_s25, [#allocation6]  }
  0x16   :  { %s1083_s14 = smov [#allocation8]   ;;  %s1084_s16 = smov [#allocation2]  }
  0x17   :  { %s56_s15 = sshll.u32 %s1083_s14, 4  ;;  %s24_s17 = sshll.u32 %s1084_s16, 4  ;;  %s57_s15 = int_to_ptr.vmem [resolvable:$true] %s56_s15  ;;  %s25_s17 = int_to_ptr.vmem [resolvable:$true] %s24_s17 }
  0x18   :  { %s916_s20 = scalar_lea.hbm %s1284_s3, 6144 }
  0x19   :  { %p917_p8 = scmp.ne.s32.totalorder %s1284_s3, %s916_s20  ;;  %p920_p9 = scmp.lt.u32.totalorder %s916_s20, %s1284_s3 }
  0x1b   :  { %p922_p10 = pnand %p920_p9, %p917_p8 }
  0x1d   :  { %925 = shalt.err (!%p922_p10)
}
  0x1e   :  { %s926_s1 = scalar_lea.vmem %s57_s15, 6144  ;;  %p931_p12 = scmp.lt.s32.totalorder %s57_s15, %s57_s15 }
  0x1f   :  { %p927_p11 = scmp.ne.s32.totalorder %s57_s15, %s926_s1  ;;  %p932_p13 = scmp.lt.s32.totalorder %s926_s1, %s926_s1 }
  0x21   :  { %p933_p0 = por %p932_p13, %p931_p12 }
  0x23   :  { %p934_p1 = pnand %p933_p0, %p927_p11 }
  0x25   :  { %937 = shalt.err (!%p934_p1)
}
  0x26   :  { %s1085_s25 = smov 128   ;;  %s1086_s26 = smov 8  }
  0x27   :  { %62 = dma.hbm_to_vmem [thread:$0]  %s1284_s3, 6144, %s57_s15, [#allocation9], %s1085_s25, %s1085_s25, %s1086_s26  }
  0x28   :  { %s938_s8 = scalar_lea.hbm %s1281_s0, 512 }
  0x29   :  { %p939_p2 = scmp.ne.s32.totalorder %s1281_s0, %s938_s8  ;;  %p942_p3 = scmp.lt.u32.totalorder %s938_s8, %s1281_s0 }
  0x2b   :  { %p944_p4 = pnand %p942_p3, %p939_p2 }
  0x2d   :  { %947 = shalt.err (!%p944_p4)
}
  0x2e   :  { %s948_s13 = scalar_lea.vmem %s25_s17, 512  ;;  %p953_p6 = scmp.lt.s32.totalorder %s25_s17, %s25_s17 }
  0x2f   :  { %p949_p5 = scmp.ne.s32.totalorder %s25_s17, %s948_s13  ;;  %p954_p7 = scmp.lt.s32.totalorder %s948_s13, %s948_s13 }
  0x31   :  { %p955_p8 = por %p954_p7, %p953_p6 }
  0x33   :  { %p956_p9 = pnand %p955_p8, %p949_p5 }
  0x35   :  { %959 = shalt.err (!%p956_p9)
}
  0x36   :  { %30 = dma.hbm_to_vmem [thread:$0]  %s1281_s0, 512, %s25_s17, [#allocation3], %s1085_s25, %s1085_s25, %s1086_s26  }
  0x37   :  { %s1087_s15 = smov [#allocation7]   ;;  %s1088_s18 = smov [#allocation10]  }
  0x38   :  { %s47_s16 = sshll.u32 %s1087_s15, 4  ;;  %s68_s19 = sshll.u32 %s1088_s18, 4  ;;  %s48_s16 = int_to_ptr.vmem [resolvable:$true] %s47_s16  ;;  %s69_s19 = int_to_ptr.vmem [resolvable:$true] %s68_s19 }
  0x39   :  { %s960_s22 = scalar_lea.hbm %s1283_s2, 16 }
  0x3a   :  { %p961_p10 = scmp.ne.s32.totalorder %s1283_s2, %s960_s22  ;;  %p964_p11 = scmp.lt.u32.totalorder %s960_s22, %s1283_s2 }
  0x3c   :  { %p966_p12 = pnand %p964_p11, %p961_p10 }
  0x3e   :  { %969 = shalt.err (!%p966_p12)
}
  0x3f   :  { %s970_s0 = scalar_lea.vmem %s48_s16, 16  ;;  %s974_s17 = scalar_lea.vmem %s48_s16, 32 }
  0x40   :  { %p971_p13 = scmp.ne.s32.totalorder %s48_s16, %s970_s0  ;;  %p975_p0 = scmp.lt.s32.totalorder %s48_s16, %s48_s16 }
  0x41   :  { %p976_p1 = scmp.lt.s32.totalorder %s974_s17, %s970_s0 }
  0x43   :  { %p977_p2 = por %p976_p1, %p975_p0 }
  0x45   :  { %p978_p3 = pnand %p977_p2, %p971_p13 }
  0x47   :  { %981 = shalt.err (!%p978_p3)
}
  0x48   :  { %50 = dma.hbm_to_vmem [thread:$0]  %s1283_s2, 16, %s48_s16, [#allocation6]  }
  0x49   :  { %s982_s9 = scalar_lea.hbm %s1285_s4, 512 }
  0x4a   :  { %p983_p4 = scmp.ne.s32.totalorder %s1285_s4, %s982_s9  ;;  %p986_p5 = scmp.lt.u32.totalorder %s982_s9, %s1285_s4 }
  0x4c   :  { %p988_p6 = pnand %p986_p5, %p983_p4 }
  0x4e   :  { %991 = shalt.err (!%p988_p6)
}
  0x4f   :  { %s992_s3 = scalar_lea.vmem %s69_s19, 512  ;;  %p997_p8 = scmp.lt.s32.totalorder %s69_s19, %s69_s19 }
  0x50   :  { %p993_p7 = scmp.ne.s32.totalorder %s69_s19, %s992_s3  ;;  %p998_p9 = scmp.lt.s32.totalorder %s992_s3, %s992_s3 }
  0x52   :  { %p999_p10 = por %p998_p9, %p997_p8 }
  0x54   :  { %p1000_p11 = pnand %p999_p10, %p993_p7 }
  0x56   :  { %1003 = shalt.err (!%p1000_p11)
}
  0x57   :  { %74 = dma.hbm_to_vmem [thread:$0]  %s1285_s4, 512, %s69_s19, [#allocation9], %s1085_s25, %s1085_s25, %s1086_s26  }
  0x58   :  { %s1089_s15 = smov [#allocation11]   ;;  %s1004_s21 = scalar_lea.hbm %s1286_s5, 512 }
  0x59   :  { %s80_s16 = sshll.u32 %s1089_s15, 4  ;;  %p1005_p12 = scmp.ne.s32.totalorder %s1286_s5, %s1004_s21  ;;  %s81_s16 = int_to_ptr.vmem [resolvable:$true] %s80_s16 }
  0x5a   :  { %p1008_p13 = scmp.lt.u32.totalorder %s1004_s21, %s1286_s5 }
  0x5c   :  { %p1010_p0 = pnand %p1008_p13, %p1005_p12 }
  0x5e   :  { %1013 = shalt.err (!%p1010_p0)
}
  0x5f   :  { %s1014_s27 = scalar_lea.vmem %s81_s16, 512  ;;  %p1019_p2 = scmp.lt.s32.totalorder %s81_s16, %s81_s16 }
  0x60   :  { %p1015_p1 = scmp.ne.s32.totalorder %s81_s16, %s1014_s27  ;;  %p1020_p3 = scmp.lt.s32.totalorder %s1014_s27, %s1014_s27 }
  0x62   :  { %p1021_p4 = por %p1020_p3, %p1019_p2 }
  0x64   :  { %p1022_p5 = pnand %p1021_p4, %p1015_p1 }
  0x66   :  { %1025 = shalt.err (!%p1022_p5)
}
  0x67   :  { %86 = dma.hbm_to_vmem [thread:$0]  %s1286_s5, 512, %s81_s16, [#allocation12], %s1085_s25, %s1085_s25, %s1086_s26  }
  0x68   :  { %1070 = dma.done.wait [#allocation3], 512  }
  0x69   :  { %1071 = vsyncadd [#allocation3], 4294966784 }
  0x6a   :  { %1072 = dma.done.wait [#allocation6], 32  }
  0x6b   :  { %1073 = vsyncadd [#allocation6], 4294967264 }
  0x6c   :  { %1074 = dma.done.wait [#allocation9], 6656  }
  0x6d   :  { %1075 = vsyncadd [#allocation9], 4294960640 }
  0x6e   :  { %1076 = dma.done.wait [#allocation12], 512  }
  0x6f   :  { %1077 = vsyncadd [#allocation12], 4294966784  ;;  %v1090_v0 = vmov 0   ;;  %v146_v1 = vld [vmem:[#allocation10] sm:$0xff]  ;;  %v148_v2 = vld [vmem:[#allocation10 + $0x10] sm:$0xff]  ;;  %v139_v35 = vlaneseq  ;;  %s1091_s5 = smov [#allocation13]  }
  0x70   :  { %892 = vset.pattern.permute.xlu0 %v1090_v0  ;;  %893 = vset.pattern.permute.xlu1 %v1090_v0  ;;  %v147_v3 = vld [vmem:[#allocation10 + $0x8] sm:$0xff]  ;;  %v149_v4 = vld [vmem:[#allocation10 + $0x18] sm:$0xff]  ;;  %v228_v5 = vld [vmem:[#allocation8 + $0x80] sm:$0xff]  ;;  %s556_s0 = sshll.u32 %s1091_s5, 4  ;;  %s557_s0 = int_to_ptr.vmem [resolvable:$true] %s556_s0 }
  0x71   :  { %152 = vperm.xlu0 %892, %v146_v1   ;;  %162 = vperm.xlu1 %893, %v148_v2   ;;  %v229_v6 = vld [vmem:[#allocation8 + $0x88] sm:$0xff]  ;;  %v230_v7 = vld [vmem:[#allocation8 + $0x90] sm:$0xff]  ;;  %v231_v8 = vld [vmem:[#allocation8 + $0x98] sm:$0xff]  ;;  %v140_v50 = vshrl.u32 %v139_v35, 7  ;;  %s1026_s17 = scalar_lea.vmem %s557_s0, 512  ;;  %p1031_p7 = scmp.lt.s32.totalorder %s557_s0, %s557_s0 }
  0x72   :  { %v183_v9 = vld [vmem:[#allocation11] sm:$0xff]  ;;  %v761_v10 = vpack.c.bf16 %v229_v6, %v228_v5  ;;  %v765_v11 = vpack.c.bf16 %v231_v8, %v230_v7  ;;  %v233_v14 = vld [vmem:[#allocation8 + $0xa8] sm:$0xff]  ;;  %v213_v18 = vld [vmem:[#allocation8 + $0x10] sm:$0xff]  ;;  %p1027_p6 = scmp.ne.s32.totalorder %s557_s0, %s1026_s17  ;;  %p1032_p8 = scmp.lt.s32.totalorder %s1026_s17, %s1026_s17 }
  0x73   :  { %v211_v12 = vld [vmem:[#allocation8] sm:$0xff]  ;;  %v212_v15 = vld [vmem:[#allocation8 + $0x8] sm:$0xff]  ;;  %v214_v19 = vld [vmem:[#allocation8 + $0x18] sm:$0xff]  ;;  %vm178_vm0 = vcmp.lt.s32.totalorder %v140_v50, 7  ;;  %vm141_vm1 = vcmp.lt.s32.totalorder %v140_v50, 1 }
  0x74   :  { %v232_v13 = vld [vmem:[#allocation8 + $0xa0] sm:$0xff]  ;;  %v184_v16 = vld [vmem:[#allocation11 + $0x8] sm:$0xff]  ;;  %762 = vmatprep.subr.bf16.mxu1 %v761_v10  ;;  %v793_v17 = vpack.c.bf16 %v212_v15, %v211_v12  ;;  %v797_v20 = vpack.c.bf16 %v214_v19, %v213_v18  ;;  %v234_v24 = vld [vmem:[#allocation8 + $0xb0] sm:$0xff]  ;;  %p1033_p9 = por %p1032_p8, %p1031_p7 }
  0x75   :  { %157 = vperm.xlu0 %892, %v147_v3   ;;  %167 = vperm.xlu1 %893, %v149_v4   ;;  %v769_v21 = vpack.c.bf16 %v233_v14, %v232_v13  ;;  %v215_v22 = vld [vmem:[#allocation8 + $0x20] sm:$0xff]  ;;  %v216_v23 = vld [vmem:[#allocation8 + $0x28] sm:$0xff]  ;;  %v235_v25 = vld [vmem:[#allocation8 + $0xb8] sm:$0xff] }
  0x76   :  { %764 = vmatpush3.bf16.msra.mxu1 %v761_v10  ;;  %794 = vmatprep.subr.bf16.mxu0 %v793_v17  ;;  %v185_v26 = vld [vmem:[#allocation11 + $0x10] sm:$0xff]  ;;  %v186_v27 = vld [vmem:[#allocation11 + $0x18] sm:$0xff]  ;;  %v801_v28 = vpack.c.bf16 %v216_v23, %v215_v22  ;;  %v773_v31 = vpack.c.bf16 %v235_v25, %v234_v24  ;;  %v236_v36 = vld [vmem:[#allocation8 + $0xc0] sm:$0xff]  ;;  %p1034_p10 = pnand %p1033_p9, %p1027_p6 }
  0x77   :  { %766 = vmatprep.subr.bf16.mxu1 %v765_v11  ;;  %796 = vmatpush3.bf16.msra.mxu0 %v793_v17  ;;  %v217_v29 = vld [vmem:[#allocation8 + $0x30] sm:$0xff]  ;;  %v218_v30 = vld [vmem:[#allocation8 + $0x38] sm:$0xff]  ;;  %v237_v37 = vld [vmem:[#allocation8 + $0xc8] sm:$0xff] }
  0x78   :  { %798 = vmatprep.subr.bf16.mxu0 %v797_v20  ;;  %v105_v32 = vld [vmem:[#allocation2] sm:$0xff]  ;;  %v106_v39 = vld [vmem:[#allocation2 + $0x8] sm:$0xff]  ;;  %v238_v41 = vld [vmem:[#allocation8 + $0xd0] sm:$0xff]  ;;  %v805_v43 = vpack.c.bf16 %v218_v30, %v217_v29  ;;  %v777_v45 = vpack.c.bf16 %v237_v37, %v236_v36 }
  0x79   :  { %189 = vperm.xlu0 %892, %v183_v9   ;;  %194 = vperm.xlu1 %893, %v184_v16   ;;  %v585_v33 = vld [vmem:[#allocation5] ss:$0 sm:$0xff]  ;;  %v586_v34 = vld [vmem:[#allocation7] ss:$0 sm:$0xff]  ;;  %v219_v46 = vld [vmem:[#allocation8 + $0x40] sm:$0xff] }
  0x7a   :  { %768 = vmatpush3.bf16.msra.mxu1 %v765_v11  ;;  %v116_v38 = vmul.f32 %v585_v33, %v105_v32  ;;  %v117_v40 = vmul.f32 %v585_v33, %v106_v39  ;;  %v239_v42 = vld [vmem:[#allocation8 + $0xd8] sm:$0xff]  ;;  %v220_v47 = vld [vmem:[#allocation8 + $0x48] sm:$0xff]  ;;  %v221_v60 = vld [vmem:[#allocation8 + $0x50] sm:$0xff] }
  0x7b   :  { %770 = vmatprep.subr.bf16.mxu1 %v769_v21  ;;  %800 = vmatpush3.bf16.msra.mxu0 %v797_v20  ;;  %v108_v49 = vld [vmem:[#allocation2 + $0x18] sm:$0xff]  ;;  %v107_v53 = vld [vmem:[#allocation2 + $0x10] sm:$0xff]  ;;  %v781_v56 = vpack.c.bf16 %v239_v42, %v238_v41  ;;  %v809_v57 = vpack.c.bf16 %v220_v47, %v219_v46  ;;  %v240_v2 = vld [vmem:[#allocation8 + $0xe0] sm:$0xff] }
  0x7c   :  { %802 = vmatprep.subr.bf16.mxu0 %v801_v28  ;;  %v127_v44 = vadd.f32 %v586_v34, %v116_v38  ;;  %v128_v48 = vadd.f32 %v586_v34, %v117_v40  ;;  %v119_v52 = vmul.f32 %v585_v33, %v108_v49  ;;  %v118_v55 = vmul.f32 %v585_v33, %v107_v53  ;;  %v222_v61 = vld [vmem:[#allocation8 + $0x58] sm:$0xff]  ;;  %v241_v3 = vld [vmem:[#allocation8 + $0xe8] sm:$0xff]  ;;  %v223_v12 = vld [vmem:[#allocation8 + $0x60] sm:$0xff] }
  0x7d   :  { %199 = vperm.xlu0 %892, %v185_v26   ;;  %204 = vperm.xlu1 %893, %v186_v27   ;;  %v813_v8 = vpack.c.bf16 %v222_v61, %v221_v60  ;;  %v785_v11 = vpack.c.bf16 %v241_v3, %v240_v2  ;;  %v224_v13 = vld [vmem:[#allocation8 + $0x68] sm:$0xff]  ;;  %v242_v16 = vld [vmem:[#allocation8 + $0xf0] sm:$0xff]  ;;  %v243_v17 = vld [vmem:[#allocation8 + $0xf8] sm:$0xff] }
  0x7e   :  { %772 = vmatpush3.bf16.msra.mxu1 %v769_v21  ;;  %v131_v51 = vmax.f32 %v127_v44, 0.0  ;;  %v1217_v54 = vmax.f32 %v128_v48, 0.0  ;;  %v130_v58 = vadd.f32 %v586_v34, %v119_v52  ;;  %v129_v63 = vadd.f32 %v586_v34, %v118_v55  ;;  %v225_v26 = vld [vmem:[#allocation8 + $0x70] sm:$0xff]  ;;  %v226_v27 = vld [vmem:[#allocation8 + $0x78] sm:$0xff]  ;;  %v416_v29 = vld [vmem:[#allocation8 + $0x108] sm:$0xff] }
  0x7f   :  { %774 = vmatprep.subr.bf16.mxu1 %v773_v31  ;;  %804 = vmatpush3.bf16.msra.mxu0 %v801_v28  ;;  %v817_v24 = vpack.c.bf16 %v224_v13, %v223_v12  ;;  %v789_v25 = vpack.c.bf16 %v243_v17, %v242_v16  ;;  %v415_v28 = vld [vmem:[#allocation8 + $0x100] sm:$0xff]  ;;  %v821_v30 = vpack.c.bf16 %v226_v27, %v225_v26  ;;  %v417_v32 = vld [vmem:[#allocation8 + $0x110] sm:$0xff]  ;;  %v418_v33 = vld [vmem:[#allocation8 + $0x118] sm:$0xff] }
  0x80   :  { %806 = vmatprep.subr.bf16.mxu0 %v805_v43  ;;  %v174_v59 = vrot.slane %v131_v51, 1  ;;  %679 = vmatprep.mubr.f32.mxu1 %v131_v51  ;;  %v135_v62 = vrot.slane %v131_v51, 7  ;;  %v136_v0 = vrot.slane %v1217_v54, 7  ;;  %v175_v1 = vrot.slane %v1217_v54, 1  ;;  %v419_v35 = vld [vmem:[#allocation8 + $0x120] sm:$0xff]  ;;  %v420_v36 = vld [vmem:[#allocation8 + $0x128] sm:$0xff] }
  0x81   :  { %v134_v4 = vmax.f32 %v130_v58, 0.0  ;;  %v133_v5 = vmax.f32 %v129_v63, 0.0  ;;  %v829_v34 = vpack.c.bf16 %v418_v33, %v417_v32  ;;  %v833_v37 = vpack.c.bf16 %v420_v36, %v419_v35  ;;  %v421_v38 = vld [vmem:[#allocation8 + $0x130] sm:$0xff]  ;;  %v422_v39 = vld [vmem:[#allocation8 + $0x138] sm:$0xff]  ;;  %v423_v41 = vld [vmem:[#allocation8 + $0x140] sm:$0xff] }
  0x82   :  { %776 = vmatpush3.bf16.msra.mxu1 %v773_v31  ;;  %v1222_v6 = vsel %vm141_vm1, %v135_v62, %v136_v0  ;;  %v1225_v7 = vsel %vm178_vm0, %v174_v59, %v175_v1  ;;  %v825_v31 = vpack.c.bf16 %v416_v29, %v415_v28  ;;  %v837_v40 = vpack.c.bf16 %v422_v39, %v421_v38  ;;  %v424_v42 = vld [vmem:[#allocation8 + $0x148] sm:$0xff]  ;;  %v425_v44 = vld [vmem:[#allocation8 + $0x150] sm:$0xff]  ;;  %v427_v47 = vld [vmem:[#allocation8 + $0x160] sm:$0xff] }
  0x83   :  { %778 = vmatprep.subr.bf16.mxu1 %v777_v45  ;;  %808 = vmatpush3.bf16.msra.mxu0 %v805_v43  ;;  %v138_v9 = vrot.slane %v134_v4, 7  ;;  %v177_v10 = vrot.slane %v134_v4, 1  ;;  %v137_v14 = vrot.slane %v133_v5, 7  ;;  %v176_v15 = vrot.slane %v133_v5, 1  ;;  %v428_v48 = vld [vmem:[#allocation8 + $0x168] sm:$0xff]  ;;  %v429_v50 = vld [vmem:[#allocation8 + $0x170] sm:$0xff] }
  0x84   :  { %810 = vmatprep.subr.bf16.mxu0 %v809_v57  ;;  %v841_v43 = vpack.c.bf16 %v424_v42, %v423_v41  ;;  %v849_v49 = vpack.c.bf16 %v428_v48, %v427_v47  ;;  %v430_v51 = vld [vmem:[#allocation8 + $0x178] sm:$0xff] }
  0x85   :  { %v1228_v18 = vsel %vm141_vm1, %v138_v9, %v135_v62  ;;  %v1231_v19 = vsel %vm178_vm0, %v177_v10, %v174_v59  ;;  %v1234_v20 = vsel %vm141_vm1, %v136_v0, %v137_v14  ;;  %v1237_v21 = vsel %vm141_vm1, %v137_v14, %v138_v9 }
  0x86   :  { %780 = vmatpush3.bf16.msra.mxu1 %v777_v45  ;;  %v1240_v22 = vsel %vm178_vm0, %v176_v15, %v177_v10  ;;  %v1243_v23 = vsel %vm178_vm0, %v175_v1, %v176_v15  ;;  %v426_v45 = vld [vmem:[#allocation8 + $0x158] sm:$0xff]  ;;  %v853_v52 = vpack.c.bf16 %v430_v51, %v429_v50 }
  0x87   :  { %782 = vmatprep.subr.bf16.mxu1 %v781_v56  ;;  %812 = vmatpush3.bf16.msra.mxu0 %v809_v57  ;;  %v845_v46 = vpack.c.bf16 %v426_v45, %v425_v44 }
  0x88   :  { %814 = vmatprep.subr.bf16.mxu0 %v813_v8 }
  0x8a   :  { %784 = vmatpush3.bf16.msra.mxu1 %v781_v56 }
  0x8b   :  { %786 = vmatprep.subr.bf16.mxu1 %v785_v11  ;;  %816 = vmatpush3.bf16.msra.mxu0 %v813_v8 }
  0x8c   :  { %818 = vmatprep.subr.bf16.mxu0 %v817_v24 }
  0x8e   :  { %788 = vmatpush3.bf16.msra.mxu1 %v785_v11 }
  0x8f   :  { %790 = vmatprep.subr.bf16.mxu1 %v789_v25  ;;  %820 = vmatpush3.bf16.msra.mxu0 %v817_v24 }
  0x90   :  { %822 = vmatprep.subr.bf16.mxu0 %v821_v30 }
  0x92   :  { %792 = vmatpush3.bf16.msra.mxu1 %v789_v25 }
  0x93   :  { %857 = vmatprep.subr.bf16.mxu1 %v825_v31  ;;  %824 = vmatpush3.bf16.msra.mxu0 %v821_v30 }
  0x94   :  { %826 = vmatprep.subr.bf16.mxu0 %v825_v31 }
  0x95   :  { %680 = vmatmul.mubr.f32.vlgmr.msra.gmra.mrb[0].mxu1 %v1217_v54 }
  0x96   :  { %865 = vmatpush3.bf16.msra.mxu1 %v825_v31  ;;  %682 = vmatprep.mubr.f32.mxu1 %v133_v5 }
  0x97   :  { %858 = vmatprep.subr.bf16.mxu1 %v829_v34 }
  0x99   :  { %683 = vmatmul.mubr.f32.gmra.mrb[2].mxu1 %v134_v4 }
  0x9a   :  { %866 = vmatpush3.bf16.msra.mxu1 %v829_v34 }
  0x9b   :  { %859 = vmatprep.subr.bf16.mxu1 %v833_v37 }
  0x9e   :  { %867 = vmatpush3.bf16.msra.mxu1 %v833_v37 }
  0x9f   :  { %860 = vmatprep.subr.bf16.mxu1 %v837_v40 }
  0xa2   :  { %868 = vmatpush3.bf16.msra.mxu1 %v837_v40 }
  0xa3   :  { %861 = vmatprep.subr.bf16.mxu1 %v841_v43 }
  0xa6   :  { %869 = vmatpush3.bf16.msra.mxu1 %v841_v43 }
  0xa7   :  { %862 = vmatprep.subr.bf16.mxu1 %v845_v46 }
  0xaa   :  { %870 = vmatpush3.bf16.msra.mxu1 %v845_v46 }
  0xab   :  { %863 = vmatprep.subr.bf16.mxu1 %v849_v49 }
  0xae   :  { %871 = vmatpush3.bf16.msra.mxu1 %v849_v49 }
  0xaf   :  { %864 = vmatprep.subr.bf16.mxu1 %v853_v52 }
  0xb2   :  { %872 = vmatpush3.bf16.msra.mxu1 %v853_v52 }
  0xf0   :  { %v153_v53 = vpop.permute.xlu0 %152  ;;  %v163_v54 = vpop.permute.xlu1 %162 }
  0xf1   :  { %v170_v55 = vmul.f32 %v153_v53, %v1228_v18  ;;  %v172_v56 = vmul.f32 %v163_v54, %v1234_v20 }
  0xf3   :  { %717 = vmatprep.mubr.f32.mxu0 %v170_v55 }
  0xf4   :  { %v158_v57 = vpop.permute.xlu0 %157  ;;  %v168_v58 = vpop.permute.xlu1 %167 }
  0xf5   :  { %v171_v59 = vmul.f32 %v158_v57, %v1222_v6  ;;  %v173_v60 = vmul.f32 %v168_v58, %v1237_v21 }
  0xf7   :  { %718 = vmatmul.mubr.f32.vlgmr.msra.gmra.mrb[0].mxu0 %v171_v59 }
  0xf8   :  { %828 = vmatpush3.bf16.msra.mxu0 %v825_v31  ;;  %v190_v61 = vpop.permute.xlu0 %189  ;;  %720 = vmatprep.mubr.f32.mxu0 %v172_v56  ;;  %v195_v62 = vpop.permute.xlu1 %194 }
  0xf9   :  { %v207_v63 = vmul.f32 %v190_v61, %v1225_v7  ;;  %830 = vmatprep.subr.bf16.mxu0 %v829_v34  ;;  %v208_v4 = vmul.f32 %v195_v62, %v1243_v23 }
  0xfb   :  { %721 = vmatmul.mubr.f32.gmra.mrb[2].mxu0 %v173_v60 }
  0xfc   :  { %832 = vmatpush3.bf16.msra.mxu0 %v829_v34  ;;  %v200_v0 = vpop.permute.xlu0 %199  ;;  %755 = vmatprep.mubr.f32.mxu0 %v207_v63  ;;  %v205_v1 = vpop.permute.xlu1 %204 }
  0xfd   :  { %v209_v2 = vmul.f32 %v200_v0, %v1240_v22  ;;  %834 = vmatprep.subr.bf16.mxu0 %v833_v37  ;;  %v210_v3 = vmul.f32 %v205_v1, %v1231_v19 }
  0xff   :  { %758 = vmatprep.mubr.f32.mxu1 %v209_v2 }
 0x100   :  { %836 = vmatpush3.bf16.msra.mxu0 %v833_v37  ;;  %759 = vmatmul.mubr.f32.vlgmr.msra.gmra.mrb[4].mxu1 %v210_v3 }
 0x101   :  { %838 = vmatprep.subr.bf16.mxu0 %v837_v40 }
 0x104   :  { %840 = vmatpush3.bf16.msra.mxu0 %v837_v40 }
 0x105   :  { %842 = vmatprep.subr.bf16.mxu0 %v841_v43 }
 0x108   :  { %844 = vmatpush3.bf16.msra.mxu0 %v841_v43 }
 0x109   :  { %846 = vmatprep.subr.bf16.mxu0 %v845_v46 }
 0x10c   :  { %848 = vmatpush3.bf16.msra.mxu0 %v845_v46 }
 0x10d   :  { %850 = vmatprep.subr.bf16.mxu0 %v849_v49 }
 0x110   :  { %852 = vmatpush3.bf16.msra.mxu0 %v849_v49 }
 0x111   :  { %854 = vmatprep.subr.bf16.mxu0 %v853_v52 }
 0x114   :  { %856 = vmatpush3.bf16.msra.mxu0 %v853_v52 }
 0x117   :  { %756 = vmatmul.mubr.f32.vlgmr.msra.gmra.mrb[0].mxu0 %v208_v4 }
 0x168   :  { %v681_v5 = vpop.f32.mrb[0].mxu1 }
 0x169   :  { %v310_v6 = vpop.f32.mrb[1].mxu1 }
 0x16c   :  { %v684_v7 = vpop.f32.mrb[2].mxu1 }
 0x16d   :  { %v320_v8 = vpop.f32.mrb[3].mxu1 }
 0x1ce   :  { %v722_v9 = vpop.f32.mrb[2].mxu0 }
 0x1cf   :  { %v411_v10 = vadd.f32 %v722_v9, %v684_v7  ;;  %v405_v11 = vpop.f32.mrb[3].mxu0 }
 0x1d0   :  { %v406_v12 = vadd.f32 %v405_v11, %v320_v8 }
 0x1d3   :  { %v760_v13 = vpop.f32.mrb[4].mxu1 }
 0x1d4   :  { %v519_v14 = vadd.f32 %v760_v13, %v411_v10  ;;  %v507_v15 = vpop.f32.mrb[5].mxu1 }
 0x1d5   :  { %v518_v16 = vadd.f32 %v507_v15, %v406_v12 }
 0x1d6   :  { %523 = vst [vmem:[#allocation13 + $0x18] sm:$0xff] %v519_v14 }
 0x1d7   :  { %522 = vst [vmem:[#allocation13 + $0x10] sm:$0xff] %v518_v16 }
 0x1ea   :  { %v757_v17 = vpop.f32.mrb[0].mxu0 }
 0x1eb   :  { %v873_v18 = vadd.f32 %v757_v17, %v681_v5  ;;  %v497_v19 = vpop.f32.mrb[1].mxu0 }
 0x1ec   :  { %v874_v20 = vadd.f32 %v497_v19, %v310_v6 }
 0x1ed   :  { %521 = vst [vmem:[#allocation13 + $0x8] sm:$0xff] %v873_v18  ;;  %v534_v21 = vmul.f32 %v873_v18, %v873_v18 }
 0x1ee   :  { %520 = vst [vmem:[#allocation13] sm:$0xff] %v874_v20  ;;  %v524_v22 = vadd.f32 %v874_v20, %v873_v18  ;;  %v533_v23 = vmul.f32 %v874_v20, %v874_v20 }
 0x1ef   :  { %1037 = shalt.err (!%p1034_p10)
}
 0x1f0   :  { %s1038_s30 = scalar_lea.hbm %s1287_s6, 512 }
 0x1f1   :  { %p1039_p11 = scmp.ne.s32.totalorder %s1287_s6, %s1038_s30  ;;  %p1042_p12 = scmp.lt.u32.totalorder %s1038_s30, %s1287_s6 }
 0x1f3   :  { %p1044_p13 = pnand %p1042_p12, %p1039_p11 }
 0x1f5   :  { %1047 = shalt.err (!%p1044_p13)
}
 0x1f6   :  { %562 = dma.vmem_to_hbm [thread:$0]  %s557_s0, 512, %s1287_s6, [#allocation4], %s1085_s25, %s1085_s25, %s1086_s26   ;;  %v535_v24 = vmul.f32 %v518_v16, %v518_v16  ;;  %v525_v25 = vadd.f32 %v524_v22, %v518_v16  ;;  %v537_v26 = vadd.f32 %v534_v21, %v533_v23  ;;  %v536_v27 = vmul.f32 %v519_v14, %v519_v14 }
 0x1f7   :  { %vm546_vm2 = vcmask 1040384   ;;  %s1092_s3 = smov [#allocation14]   ;;  %vm548_vm3 = vcmask 1041408  }
 0x1f8   :  { %v526_v28 = vadd.f32 %v525_v25, %v519_v14  ;;  %v538_v29 = vadd.f32 %v537_v26, %v535_v24  ;;  %s569_s6 = sshll.u32 %s1092_s3, 4  ;;  %s570_s6 = int_to_ptr.vmem [resolvable:$true] %s569_s6 }
 0x1f9   :  { %s1048_s25 = scalar_lea.vmem %s570_s6, 128  ;;  %p1053_p1 = scmp.lt.s32.totalorder %s570_s6, %s570_s6 }
 0x1fa   :  { %v527_v30 = vrot.slane %v526_v28, 4  ;;  %v539_v31 = vadd.f32 %v538_v29, %v536_v27  ;;  %p1049_p0 = scmp.ne.s32.totalorder %s570_s6, %s1048_s25  ;;  %p1054_p2 = scmp.lt.s32.totalorder %s1048_s25, %s1048_s25 }
 0x1fc   :  { %v528_v32 = vadd.f32 %v527_v30, %v526_v28  ;;  %v540_v33 = vrot.slane %v539_v31, 4  ;;  %p1055_p3 = por %p1054_p2, %p1053_p1 }
 0x1fe   :  { %v529_v34 = vrot.slane %v528_v32, 2  ;;  %v541_v35 = vadd.f32 %v540_v33, %v539_v31  ;;  %p1056_p4 = pnand %p1055_p3, %p1049_p0 }
 0x200   :  { %v530_v36 = vadd.f32 %v529_v34, %v528_v32  ;;  %v542_v37 = vrot.slane %v541_v35, 2 }
 0x202   :  { %v531_v38 = vrot.slane %v530_v36, 1  ;;  %v543_v39 = vadd.f32 %v542_v37, %v541_v35 }
 0x204   :  { %v544_v40 = vrot.slane %v543_v39, 1  ;;  %v532_v41 = vadd.f32 %v531_v38, %v530_v36 }
 0x206   :  { %v545_v42 = vadd.f32 %v544_v40, %v543_v39 }
 0x208   :  { %v547_v43 = vsel %vm546_vm2, %v532_v41, %v545_v42 }
 0x209   :  { %v549_v44 = vsel %vm548_vm3, %v547_v43, 0.0 }
 0x20a   :  { %550 = vst [vmem:[#allocation14] sm:$0xff] %v549_v44 }
 0x20b   :  { %1059 = shalt.err (!%p1056_p4)
}
 0x20c   :  { %s1060_s14 = scalar_lea.hbm %s1288_s7, 128 }
 0x20d   :  { %p1061_p5 = scmp.ne.s32.totalorder %s1288_s7, %s1060_s14  ;;  %p1064_p6 = scmp.lt.u32.totalorder %s1060_s14, %s1288_s7 }
 0x20f   :  { %p1066_p7 = pnand %p1064_p6, %p1061_p5 }
 0x211   :  { %1069 = shalt.err (!%p1066_p7)
}
 0x212   :  { %572 = dma.vmem_to_hbm [thread:$0]  %s570_s6, 128, %s1288_s7, [#allocation15]  }
 0x213   :  { %1078 = dma.done.wait [#allocation4], 512  }
 0x214   :  { %1079 = vsyncadd [#allocation4], 4294966784 }
 0x215   :  { %1080 = dma.done.wait [#allocation15], 128  }
 0x216   :  { %1081 = vsyncadd [#allocation15], 4294967168 }
 0x217   :  { %579 = vsyncpa [#allocation3], 1 }
 0x218   :  { %580 = vsyncpa [#allocation6], 1 }
 0x219   :  { %581 = vsyncpa [#allocation9], 1 }
 0x21a   :  { %582 = vsyncpa [#allocation12], 1 }
 0x21b   :  { %583 = vsyncpa [#allocation4], 1 }
 0x21c   :  { %584 = vsyncpa [#allocation15], 1 }

</bundles_post_ra>
